<compile_context>
chip_gen: v7x
topology: tpu7x:2x2x1
jax: 0.10.0
libtpu: 0.0.40
codegen_flags: <defaults>
</compile_context>

<pallas_src>
import jax
import jax.numpy as jnp
from jax.experimental import pallas as pl
from jax.experimental.pallas import tpu as pltpu

# ----------------------------- config (small shapes) ------------------------
N_BATCH = 2
C_IN = 3
H = W = 16
QUANT_DIM = 32                 # encoder output channels (== self.quant_dim)
N_PARTS = 2
VQ_D = QUANT_DIM // N_PARTS    # 16
N_EMBED = 128                  # codebook size (reference default 1024, kept small)
COMMITMENT = 1.0

# ---- packed parameter slab layout (all row offsets 8-sublane aligned) -------
_PT_ROW = 0     # rows  0:12            : encoder input patches pT (Cin*4, R)
_WE_ROW = 16    # rows 16:48, cols 0:12 : we (C, Cin*4); col 12 : be (C, 1)
_WD_ROW = 48    # rows 48:60, cols 0:32 : wdT (Cin*4, C); col 32 : bd (Cin*4, 1)
_SQ_ROW = 64    # row  64,    cols 0:E  : ||cb||^2 (1, E)
_SLAB_ROWS = 72


# ----------------------------- fused Pallas kernel --------------------------
def _fused_kernel(slab_ref, cbt_bd_ref, cb_bd_ref, out_ref):
    """Encoder GEMM + split-VQ (shared codebook) + decoder GEMM, all in vregs.

    slab:   (72, R)          packed small operands (see layout above)
    cbt_bd: (R, n_blk*E)     block-diagonal codebook^T (one block per 16-lane chunk)
    cb_bd:  (n_blk*E, R)     block-diagonal codebook
    out:    (Cin*4 + 4, R)   rows 0:12 = decoder patches, rows 12:16 = commit loss
    """
    C = QUANT_DIM
    P4 = C_IN * 4
    d = VQ_D
    R = slab_ref.shape[1]               # 128 = N * H/2 * W/2 (lane-dense)
    n_blk = R // d                      # 8 chunks == all (batch, part, position) vectors
    E = cbt_bd_ref.shape[1] // n_blk    # codebook entries

    # static, tile-aligned views into the packed slab (single input DMA)
    pT   = slab_ref[_PT_ROW:_PT_ROW + P4, :]            # (12, R)
    we   = slab_ref[_WE_ROW:_WE_ROW + C, 0:P4]           # (32, 12)
    be   = slab_ref[_WE_ROW:_WE_ROW + C, P4:P4 + 1]      # (32, 1)
    wdT  = slab_ref[_WD_ROW:_WD_ROW + P4, 0:C]           # (12, 32)
    bd   = slab_ref[_WD_ROW:_WD_ROW + P4, C:C + 1]       # (12, 1)
    cbsq = slab_ref[_SQ_ROW:_SQ_ROW + 1, 0:E]            # (1, E) = ||cb||^2

    # -- encoder: 2x2 / stride-2 conv as a single GEMM, kept channel-major ----
    #    enc[c, n*S + s] is exactly the NCHW memory of the torch encoder
    #    output, so the reference `.view((N,H',W',C))` is free: every 16-lane
    #    chunk of a row is one VQ vector of the reference.
    enc = jnp.dot(we, pT, preferred_element_type=jnp.float32) + be     # (32, R)

    # -- vector quantization: all 256 vectors (both parts & batches) at once --
    #    One block-diagonal distance GEMM replaces 8 tiny K=16 matmuls.
    dots = jnp.dot(enc, cbt_bd_ref[...],
                   preferred_element_type=jnp.float32)                 # (32, n_blk*E)

    lane = jax.lax.broadcasted_iota(jnp.int32, (C, E), 1)               # hoisted
    big = jnp.iinfo(jnp.int32).max
    onehots = []
    for blk in range(n_blk):            # static unroll; slices are vreg-aligned views
        d_blk = cbsq - 2.0 * dots[:, blk * E:(blk + 1) * E]             # ||x||^2 dropped
        min_d = jnp.min(d_blk, axis=-1, keepdims=True)
        # first-index tie-break (torch argmin semantics), exact in f32
        idx = jnp.min(jnp.where(d_blk <= min_d, lane, big), axis=-1, keepdims=True)
        onehots.append((lane == idx).astype(jnp.float32))
    onehot = jnp.concatenate(onehots, axis=1)                           # (32, n_blk*E)

    #    One block-diagonal gather GEMM lands z_q directly in the (C, R)
    #    layout, i.e. the NCHW memory the torch `.view((N,C,H',W'))` expects.
    zq = jnp.dot(onehot, cb_bd_ref[...],
                 preferred_element_type=jnp.float32)                    # (32, R)

    # -- commitment loss: one reduction at the end ----------------------------
    #    sum over parts of F.mse_loss(z_q.detach(), z_e); equals total_sq/(R*d)
    #    only because both parts have identical element counts.
    diff = zq - enc
    sq = jnp.sum(diff * diff, axis=(0, 1), keepdims=True)               # (1, 1)
    loss = (COMMITMENT / float(R * d)) * sq

    # -- decoder: 2x2 / stride-2 transposed conv as a single GEMM -------------
    dec = jnp.dot(wdT, zq, preferred_element_type=jnp.float32) + bd     # (12, R)

    # single lane-dense output tile: patches + loss stashed in the pad rows
    out_ref[0:P4, :] = dec
    out_ref[P4:, :] = jnp.broadcast_to(loss, (out_ref.shape[0] - P4, R))


# ----------------------------- model params ---------------------------------
def init_params(key):
    k1, k2, k3, k4, k5 = jax.random.split(key, 5)
    return {
        # encoder Conv2d(3, QUANT_DIM, kernel=2, stride=2): weight (out,in,kh,kw)
        "w_enc": 0.1 * jax.random.normal(k1, (QUANT_DIM, C_IN, 2, 2), jnp.float32),
        "b_enc": 0.1 * jax.random.normal(k2, (QUANT_DIM,), jnp.float32),
        # decoder ConvTranspose2d(QUANT_DIM, 3, kernel=2, stride=2): weight (in,out,kh,kw)
        "w_dec": 0.1 * jax.random.normal(k3, (QUANT_DIM, C_IN, 2, 2), jnp.float32),
        "b_dec": 0.1 * jax.random.normal(k4, (C_IN,), jnp.float32),
        # single shared VQ quantizer for all parts (as in the reference)
        "codebook": jax.random.normal(k5, (N_EMBED, VQ_D), jnp.float32),
    }


# ----------------------------- model forward --------------------------------
def mobilenet10_forward(x, params):
    N, Cin, Hin, Win = x.shape
    Hp, Wp = Hin // 2, Win // 2
    S = Hp * Wp
    R = N * S
    C = QUANT_DIM
    d = VQ_D
    P4 = Cin * 4
    E = params["codebook"].shape[0]
    n_blk = R // d
    assert S % d == 0 and C % N_PARTS == 0
    assert R == 128 and E <= R          # slab packing below assumes a 128-lane slab

    # ---- layout prep: touches only the kernel's input / params (XLA, tiny) --
    # stride-2 2x2 patches, tap-major rows x (batch, spatial) lanes: (Cin*4, R)
    pT = (x.reshape(N, Cin, Hp, 2, Wp, 2)
            .transpose(1, 3, 5, 0, 2, 4)
            .reshape(P4, R))
    we = params["w_enc"].reshape(C, P4)                    # (32, 12)
    be = params["b_enc"].reshape(C, 1)
    wdT = params["w_dec"].reshape(C, P4).T                 # (12, 32)
    bd = jnp.repeat(params["b_dec"], 4).reshape(P4, 1)
    cb = params["codebook"]                                # (E, d)
    cbsq = jnp.sum(cb * cb, axis=1).reshape(1, E)          # (1, E)

    # one packed slab -> single input DMA for all small operands
    slab = jnp.zeros((_SLAB_ROWS, R), jnp.float32)
    slab = slab.at[_PT_ROW:_PT_ROW + P4, :].set(pT)
    slab = slab.at[_WE_ROW:_WE_ROW + C, 0:P4].set(we)
    slab = slab.at[_WE_ROW:_WE_ROW + C, P4:P4 + 1].set(be)
    slab = slab.at[_WD_ROW:_WD_ROW + P4, 0:C].set(wdT)
    slab = slab.at[_WD_ROW:_WD_ROW + P4, C:C + 1].set(bd)
    slab = slab.at[_SQ_ROW:_SQ_ROW + 1, 0:E].set(cbsq)

    # block-diagonal codebook operands (one 16x128 / 128x16 block per chunk)
    cb_bd = jnp.kron(jnp.eye(n_blk, dtype=jnp.float32), cb)    # (n_blk*E, R)
    cbt_bd = cb_bd.T                                           # (R, n_blk*E)

    vmem = pl.BlockSpec(memory_space=pltpu.MemorySpace.VMEM)
    out16 = pl.pallas_call(
        _fused_kernel,
        out_shape=jax.ShapeDtypeStruct((P4 + 4, R), jnp.float32),
        in_specs=[vmem, vmem, vmem],
        out_specs=vmem,
    )(slab, cbt_bd, cb_bd)

    decT = out16[:P4]            # decoder 2x2 patches, (12, R)
    loss = out16[P4, 0]          # commit loss scalar stashed in the pad rows

    # ---- scatter decoder 2x2 patches back to NCHW (output-only layout op) ---
    out = (decT.reshape(Cin, 2, 2, N, Hp, Wp)
               .transpose(3, 0, 4, 1, 5, 2)
               .reshape(N, Cin, Hin, Win))
    return out, loss


if __name__ == "__main__":
    key = jax.random.PRNGKey(0)
    kx, kp = jax.random.split(key)
    x = jax.random.normal(kx, (N_BATCH, C_IN, H, W), jnp.float32)
    params = init_params(kp)

    fwd = jax.jit(mobilenet10_forward)
    out, commit_loss = fwd(x, params)
    out, commit_loss = jax.block_until_ready((out, commit_loss))

    assert out.shape == (N_BATCH, C_IN, H, W)
    assert commit_loss.shape == ()
    assert bool(jnp.all(jnp.isfinite(out)))
    assert bool(jnp.isfinite(commit_loss))
    print("KERNEL_OK")
</pallas_src>

<mosaic_0001>
module attributes {stable_mosaic.version = 11 : i64} {
  func.func @_fused_kernel(%arg0: memref<72x128xf32, #tpu.memory_space<vmem>>, %arg1: memref<128x1024xf32, #tpu.memory_space<vmem>>, %arg2: memref<1024x128xf32, #tpu.memory_space<vmem>>, %arg3: memref<16x128xf32, #tpu.memory_space<vmem>>) attributes {dimension_semantics = [], scalar_prefetch = 0 : i64, scratch_operands = 0 : i64, tpu.core_type = #tpu.core_type<tc>} {
    %c0 = arith.constant 0 : index
    %c0_0 = arith.constant 0 : index
    %0 = vector.load %arg0[%c0, %c0_0] : memref<72x128xf32, #tpu.memory_space<vmem>>, vector<12x128xf32>
    %c16 = arith.constant 16 : index
    %c0_1 = arith.constant 0 : index
    %1 = vector.load %arg0[%c16, %c0_1] : memref<72x128xf32, #tpu.memory_space<vmem>>, vector<32x12xf32>
    %c16_2 = arith.constant 16 : index
    %c12 = arith.constant 12 : index
    %2 = vector.load %arg0[%c16_2, %c12] : memref<72x128xf32, #tpu.memory_space<vmem>>, vector<32x1xf32>
    %c48 = arith.constant 48 : index
    %c0_3 = arith.constant 0 : index
    %3 = vector.load %arg0[%c48, %c0_3] : memref<72x128xf32, #tpu.memory_space<vmem>>, vector<12x32xf32>
    %c48_4 = arith.constant 48 : index
    %c32 = arith.constant 32 : index
    %4 = vector.load %arg0[%c48_4, %c32] : memref<72x128xf32, #tpu.memory_space<vmem>>, vector<12x1xf32>
    %c64 = arith.constant 64 : index
    %c0_5 = arith.constant 0 : index
    %5 = vector.load %arg0[%c64, %c0_5] : memref<72x128xf32, #tpu.memory_space<vmem>>, vector<1x128xf32>
    %cst = arith.constant dense<0.000000e+00> : vector<32x128xf32>
    %6 = tpu.matmul %1, %0, %cst {dimension_numbers = #tpu.dot_dimension_numbers<[1], [0], [0], [1], [0, 0, 1, 1], [], []>} : vector<32x12xf32>, vector<12x128xf32>, vector<32x128xf32> -> vector<32x128xf32>
    %7 = vector.broadcast %2 : vector<32x1xf32> to vector<32x128xf32>
    %8 = arith.addf %6, %7 : vector<32x128xf32>
    %c0_6 = arith.constant 0 : index
    %c0_7 = arith.constant 0 : index
    %9 = vector.load %arg1[%c0_6, %c0_7] : memref<128x1024xf32, #tpu.memory_space<vmem>>, vector<128x1024xf32>
    %cst_8 = arith.constant dense<0.000000e+00> : vector<32x1024xf32>
    %10 = tpu.matmul %8, %9, %cst_8 {dimension_numbers = #tpu.dot_dimension_numbers<[1], [0], [0], [1], [0, 0, 1, 1], [], []>} : vector<32x128xf32>, vector<128x1024xf32>, vector<32x1024xf32> -> vector<32x1024xf32>
    %11 = tpu.iota {dimensions = array<i32: 1>} : vector<32x128xi32>
    %12 = vector.extract_strided_slice %10 {offsets = [0, 0], sizes = [32, 128], strides = [1, 1]} : vector<32x1024xf32> to vector<32x128xf32>
    %cst_9 = arith.constant 2.000000e+00 : f32
    %13 = vector.broadcast %cst_9 : f32 to vector<32x128xf32>
    %14 = arith.mulf %13, %12 : vector<32x128xf32>
    %15 = vector.broadcast %5 : vector<1x128xf32> to vector<32x128xf32>
    %16 = arith.subf %15, %14 : vector<32x128xf32>
    %cst_10 = arith.constant dense<0x7F800000> : vector<32xf32>
    %17 = vector.multi_reduction <minimumf>, %16, %cst_10 [1] : vector<32x128xf32> to vector<32xf32>
    %18 = vector.shape_cast %17 : vector<32xf32> to vector<32x1xf32>
    %19 = vector.broadcast %18 : vector<32x1xf32> to vector<32x128xf32>
    %20 = arith.cmpf ole, %16, %19 : vector<32x128xf32>
    %c2147483647_i32 = arith.constant 2147483647 : i32
    %21 = vector.broadcast %c2147483647_i32 : i32 to vector<32x128xi32>
    %22 = arith.select %20, %11, %21 : vector<32x128xi1>, vector<32x128xi32>
    %cst_11 = arith.constant dense<2147483647> : vector<32xi32>
    %23 = vector.multi_reduction <minsi>, %22, %cst_11 [1] : vector<32x128xi32> to vector<32xi32>
    %24 = vector.shape_cast %23 : vector<32xi32> to vector<32x1xi32>
    %25 = vector.broadcast %24 : vector<32x1xi32> to vector<32x128xi32>
    %26 = arith.cmpi eq, %11, %25 : vector<32x128xi32>
    %27 = arith.extui %26 : vector<32x128xi1> to vector<32x128xi32>
    %28 = arith.sitofp %27 : vector<32x128xi32> to vector<32x128xf32>
    %29 = vector.extract_strided_slice %10 {offsets = [0, 128], sizes = [32, 128], strides = [1, 1]} : vector<32x1024xf32> to vector<32x128xf32>
    %cst_12 = arith.constant 2.000000e+00 : f32
    %30 = vector.broadcast %cst_12 : f32 to vector<32x128xf32>
    %31 = arith.mulf %30, %29 : vector<32x128xf32>
    %32 = vector.broadcast %5 : vector<1x128xf32> to vector<32x128xf32>
    %33 = arith.subf %32, %31 : vector<32x128xf32>
    %cst_13 = arith.constant dense<0x7F800000> : vector<32xf32>
    %34 = vector.multi_reduction <minimumf>, %33, %cst_13 [1] : vector<32x128xf32> to vector<32xf32>
    %35 = vector.shape_cast %34 : vector<32xf32> to vector<32x1xf32>
    %36 = vector.broadcast %35 : vector<32x1xf32> to vector<32x128xf32>
    %37 = arith.cmpf ole, %33, %36 : vector<32x128xf32>
    %c2147483647_i32_14 = arith.constant 2147483647 : i32
    %38 = vector.broadcast %c2147483647_i32_14 : i32 to vector<32x128xi32>
    %39 = arith.select %37, %11, %38 : vector<32x128xi1>, vector<32x128xi32>
    %cst_15 = arith.constant dense<2147483647> : vector<32xi32>
    %40 = vector.multi_reduction <minsi>, %39, %cst_15 [1] : vector<32x128xi32> to vector<32xi32>
    %41 = vector.shape_cast %40 : vector<32xi32> to vector<32x1xi32>
    %42 = vector.broadcast %41 : vector<32x1xi32> to vector<32x128xi32>
    %43 = arith.cmpi eq, %11, %42 : vector<32x128xi32>
    %44 = arith.extui %43 : vector<32x128xi1> to vector<32x128xi32>
    %45 = arith.sitofp %44 : vector<32x128xi32> to vector<32x128xf32>
    %46 = vector.extract_strided_slice %10 {offsets = [0, 256], sizes = [32, 128], strides = [1, 1]} : vector<32x1024xf32> to vector<32x128xf32>
    %cst_16 = arith.constant 2.000000e+00 : f32
    %47 = vector.broadcast %cst_16 : f32 to vector<32x128xf32>
    %48 = arith.mulf %47, %46 : vector<32x128xf32>
    %49 = vector.broadcast %5 : vector<1x128xf32> to vector<32x128xf32>
    %50 = arith.subf %49, %48 : vector<32x128xf32>
    %cst_17 = arith.constant dense<0x7F800000> : vector<32xf32>
    %51 = vector.multi_reduction <minimumf>, %50, %cst_17 [1] : vector<32x128xf32> to vector<32xf32>
    %52 = vector.shape_cast %51 : vector<32xf32> to vector<32x1xf32>
    %53 = vector.broadcast %52 : vector<32x1xf32> to vector<32x128xf32>
    %54 = arith.cmpf ole, %50, %53 : vector<32x128xf32>
    %c2147483647_i32_18 = arith.constant 2147483647 : i32
    %55 = vector.broadcast %c2147483647_i32_18 : i32 to vector<32x128xi32>
    %56 = arith.select %54, %11, %55 : vector<32x128xi1>, vector<32x128xi32>
    %cst_19 = arith.constant dense<2147483647> : vector<32xi32>
    %57 = vector.multi_reduction <minsi>, %56, %cst_19 [1] : vector<32x128xi32> to vector<32xi32>
    %58 = vector.shape_cast %57 : vector<32xi32> to vector<32x1xi32>
    %59 = vector.broadcast %58 : vector<32x1xi32> to vector<32x128xi32>
    %60 = arith.cmpi eq, %11, %59 : vector<32x128xi32>
    %61 = arith.extui %60 : vector<32x128xi1> to vector<32x128xi32>
    %62 = arith.sitofp %61 : vector<32x128xi32> to vector<32x128xf32>
    %63 = vector.extract_strided_slice %10 {offsets = [0, 384], sizes = [32, 128], strides = [1, 1]} : vector<32x1024xf32> to vector<32x128xf32>
    %cst_20 = arith.constant 2.000000e+00 : f32
    %64 = vector.broadcast %cst_20 : f32 to vector<32x128xf32>
    %65 = arith.mulf %64, %63 : vector<32x128xf32>
    %66 = vector.broadcast %5 : vector<1x128xf32> to vector<32x128xf32>
    %67 = arith.subf %66, %65 : vector<32x128xf32>
    %cst_21 = arith.constant dense<0x7F800000> : vector<32xf32>
    %68 = vector.multi_reduction <minimumf>, %67, %cst_21 [1] : vector<32x128xf32> to vector<32xf32>
    %69 = vector.shape_cast %68 : vector<32xf32> to vector<32x1xf32>
    %70 = vector.broadcast %69 : vector<32x1xf32> to vector<32x128xf32>
    %71 = arith.cmpf ole, %67, %70 : vector<32x128xf32>
    %c2147483647_i32_22 = arith.constant 2147483647 : i32
    %72 = vector.broadcast %c2147483647_i32_22 : i32 to vector<32x128xi32>
    %73 = arith.select %71, %11, %72 : vector<32x128xi1>, vector<32x128xi32>
    %cst_23 = arith.constant dense<2147483647> : vector<32xi32>
    %74 = vector.multi_reduction <minsi>, %73, %cst_23 [1] : vector<32x128xi32> to vector<32xi32>
    %75 = vector.shape_cast %74 : vector<32xi32> to vector<32x1xi32>
    %76 = vector.broadcast %75 : vector<32x1xi32> to vector<32x128xi32>
    %77 = arith.cmpi eq, %11, %76 : vector<32x128xi32>
    %78 = arith.extui %77 : vector<32x128xi1> to vector<32x128xi32>
    %79 = arith.sitofp %78 : vector<32x128xi32> to vector<32x128xf32>
    %80 = vector.extract_strided_slice %10 {offsets = [0, 512], sizes = [32, 128], strides = [1, 1]} : vector<32x1024xf32> to vector<32x128xf32>
    %cst_24 = arith.constant 2.000000e+00 : f32
    %81 = vector.broadcast %cst_24 : f32 to vector<32x128xf32>
    %82 = arith.mulf %81, %80 : vector<32x128xf32>
    %83 = vector.broadcast %5 : vector<1x128xf32> to vector<32x128xf32>
    %84 = arith.subf %83, %82 : vector<32x128xf32>
    %cst_25 = arith.constant dense<0x7F800000> : vector<32xf32>
    %85 = vector.multi_reduction <minimumf>, %84, %cst_25 [1] : vector<32x128xf32> to vector<32xf32>
    %86 = vector.shape_cast %85 : vector<32xf32> to vector<32x1xf32>
    %87 = vector.broadcast %86 : vector<32x1xf32> to vector<32x128xf32>
    %88 = arith.cmpf ole, %84, %87 : vector<32x128xf32>
    %c2147483647_i32_26 = arith.constant 2147483647 : i32
    %89 = vector.broadcast %c2147483647_i32_26 : i32 to vector<32x128xi32>
    %90 = arith.select %88, %11, %89 : vector<32x128xi1>, vector<32x128xi32>
    %cst_27 = arith.constant dense<2147483647> : vector<32xi32>
    %91 = vector.multi_reduction <minsi>, %90, %cst_27 [1] : vector<32x128xi32> to vector<32xi32>
    %92 = vector.shape_cast %91 : vector<32xi32> to vector<32x1xi32>
    %93 = vector.broadcast %92 : vector<32x1xi32> to vector<32x128xi32>
    %94 = arith.cmpi eq, %11, %93 : vector<32x128xi32>
    %95 = arith.extui %94 : vector<32x128xi1> to vector<32x128xi32>
    %96 = arith.sitofp %95 : vector<32x128xi32> to vector<32x128xf32>
    %97 = vector.extract_strided_slice %10 {offsets = [0, 640], sizes = [32, 128], strides = [1, 1]} : vector<32x1024xf32> to vector<32x128xf32>
    %cst_28 = arith.constant 2.000000e+00 : f32
    %98 = vector.broadcast %cst_28 : f32 to vector<32x128xf32>
    %99 = arith.mulf %98, %97 : vector<32x128xf32>
    %100 = vector.broadcast %5 : vector<1x128xf32> to vector<32x128xf32>
    %101 = arith.subf %100, %99 : vector<32x128xf32>
    %cst_29 = arith.constant dense<0x7F800000> : vector<32xf32>
    %102 = vector.multi_reduction <minimumf>, %101, %cst_29 [1] : vector<32x128xf32> to vector<32xf32>
    %103 = vector.shape_cast %102 : vector<32xf32> to vector<32x1xf32>
    %104 = vector.broadcast %103 : vector<32x1xf32> to vector<32x128xf32>
    %105 = arith.cmpf ole, %101, %104 : vector<32x128xf32>
    %c2147483647_i32_30 = arith.constant 2147483647 : i32
    %106 = vector.broadcast %c2147483647_i32_30 : i32 to vector<32x128xi32>
    %107 = arith.select %105, %11, %106 : vector<32x128xi1>, vector<32x128xi32>
    %cst_31 = arith.constant dense<2147483647> : vector<32xi32>
    %108 = vector.multi_reduction <minsi>, %107, %cst_31 [1] : vector<32x128xi32> to vector<32xi32>
    %109 = vector.shape_cast %108 : vector<32xi32> to vector<32x1xi32>
    %110 = vector.broadcast %109 : vector<32x1xi32> to vector<32x128xi32>
    %111 = arith.cmpi eq, %11, %110 : vector<32x128xi32>
    %112 = arith.extui %111 : vector<32x128xi1> to vector<32x128xi32>
    %113 = arith.sitofp %112 : vector<32x128xi32> to vector<32x128xf32>
    %114 = vector.extract_strided_slice %10 {offsets = [0, 768], sizes = [32, 128], strides = [1, 1]} : vector<32x1024xf32> to vector<32x128xf32>
    %cst_32 = arith.constant 2.000000e+00 : f32
    %115 = vector.broadcast %cst_32 : f32 to vector<32x128xf32>
    %116 = arith.mulf %115, %114 : vector<32x128xf32>
    %117 = vector.broadcast %5 : vector<1x128xf32> to vector<32x128xf32>
    %118 = arith.subf %117, %116 : vector<32x128xf32>
    %cst_33 = arith.constant dense<0x7F800000> : vector<32xf32>
    %119 = vector.multi_reduction <minimumf>, %118, %cst_33 [1] : vector<32x128xf32> to vector<32xf32>
    %120 = vector.shape_cast %119 : vector<32xf32> to vector<32x1xf32>
    %121 = vector.broadcast %120 : vector<32x1xf32> to vector<32x128xf32>
    %122 = arith.cmpf ole, %118, %121 : vector<32x128xf32>
    %c2147483647_i32_34 = arith.constant 2147483647 : i32
    %123 = vector.broadcast %c2147483647_i32_34 : i32 to vector<32x128xi32>
    %124 = arith.select %122, %11, %123 : vector<32x128xi1>, vector<32x128xi32>
    %cst_35 = arith.constant dense<2147483647> : vector<32xi32>
    %125 = vector.multi_reduction <minsi>, %124, %cst_35 [1] : vector<32x128xi32> to vector<32xi32>
    %126 = vector.shape_cast %125 : vector<32xi32> to vector<32x1xi32>
    %127 = vector.broadcast %126 : vector<32x1xi32> to vector<32x128xi32>
    %128 = arith.cmpi eq, %11, %127 : vector<32x128xi32>
    %129 = arith.extui %128 : vector<32x128xi1> to vector<32x128xi32>
    %130 = arith.sitofp %129 : vector<32x128xi32> to vector<32x128xf32>
    %131 = vector.extract_strided_slice %10 {offsets = [0, 896], sizes = [32, 128], strides = [1, 1]} : vector<32x1024xf32> to vector<32x128xf32>
    %cst_36 = arith.constant 2.000000e+00 : f32
    %132 = vector.broadcast %cst_36 : f32 to vector<32x128xf32>
    %133 = arith.mulf %132, %131 : vector<32x128xf32>
    %134 = vector.broadcast %5 : vector<1x128xf32> to vector<32x128xf32>
    %135 = arith.subf %134, %133 : vector<32x128xf32>
    %cst_37 = arith.constant dense<0x7F800000> : vector<32xf32>
    %136 = vector.multi_reduction <minimumf>, %135, %cst_37 [1] : vector<32x128xf32> to vector<32xf32>
    %137 = vector.shape_cast %136 : vector<32xf32> to vector<32x1xf32>
    %138 = vector.broadcast %137 : vector<32x1xf32> to vector<32x128xf32>
    %139 = arith.cmpf ole, %135, %138 : vector<32x128xf32>
    %c2147483647_i32_38 = arith.constant 2147483647 : i32
    %140 = vector.broadcast %c2147483647_i32_38 : i32 to vector<32x128xi32>
    %141 = arith.select %139, %11, %140 : vector<32x128xi1>, vector<32x128xi32>
    %cst_39 = arith.constant dense<2147483647> : vector<32xi32>
    %142 = vector.multi_reduction <minsi>, %141, %cst_39 [1] : vector<32x128xi32> to vector<32xi32>
    %143 = vector.shape_cast %142 : vector<32xi32> to vector<32x1xi32>
    %144 = vector.broadcast %143 : vector<32x1xi32> to vector<32x128xi32>
    %145 = arith.cmpi eq, %11, %144 : vector<32x128xi32>
    %146 = arith.extui %145 : vector<32x128xi1> to vector<32x128xi32>
    %147 = arith.sitofp %146 : vector<32x128xi32> to vector<32x128xf32>
    %148 = tpu.concatenate %28, %45, %62, %79, %96, %113, %130, %147 in 1 : vector<32x128xf32>, vector<32x128xf32>, vector<32x128xf32>, vector<32x128xf32>, vector<32x128xf32>, vector<32x128xf32>, vector<32x128xf32>, vector<32x128xf32> -> vector<32x1024xf32>
    %c0_40 = arith.constant 0 : index
    %c0_41 = arith.constant 0 : index
    %149 = vector.load %arg2[%c0_40, %c0_41] : memref<1024x128xf32, #tpu.memory_space<vmem>>, vector<1024x128xf32>
    %cst_42 = arith.constant dense<0.000000e+00> : vector<32x128xf32>
    %150 = tpu.matmul %148, %149, %cst_42 {dimension_numbers = #tpu.dot_dimension_numbers<[1], [0], [0], [1], [0, 0, 1, 1], [], []>} : vector<32x1024xf32>, vector<1024x128xf32>, vector<32x128xf32> -> vector<32x128xf32>
    %151 = arith.subf %150, %8 : vector<32x128xf32>
    %152 = arith.mulf %151, %151 : vector<32x128xf32>
    %153 = vector.shape_cast %152 : vector<32x128xf32> to vector<1x32x128xf32>
    %cst_43 = arith.constant dense<0.000000e+00> : vector<1xf32>
    %154 = vector.multi_reduction <add>, %153, %cst_43 [1, 2] : vector<1x32x128xf32> to vector<1xf32>
    %155 = vector.shape_cast %154 : vector<1xf32> to vector<1x1x1xf32>
    %156 = vector.extract %155[0, 0, 0] : f32 from vector<1x1x1xf32>
    %157 = vector.broadcast %156 : f32 to vector<1x1xf32>
    %cst_44 = arith.constant 4.8828125E-4 : f32
    %158 = vector.broadcast %cst_44 : f32 to vector<1x1xf32>
    %159 = arith.mulf %158, %157 : vector<1x1xf32>
    %cst_45 = arith.constant dense<0.000000e+00> : vector<12x128xf32>
    %160 = tpu.matmul %3, %150, %cst_45 {dimension_numbers = #tpu.dot_dimension_numbers<[1], [0], [0], [1], [0, 0, 1, 1], [], []>} : vector<12x32xf32>, vector<32x128xf32>, vector<12x128xf32> -> vector<12x128xf32>
    %161 = vector.broadcast %4 : vector<12x1xf32> to vector<12x128xf32>
    %162 = arith.addf %160, %161 : vector<12x128xf32>
    %c0_46 = arith.constant 0 : index
    %c0_47 = arith.constant 0 : index
    %163 = vector.load %arg3[%c0_46, %c0_47] : memref<16x128xf32, #tpu.memory_space<vmem>>, vector<12x128xf32>
    tpu.vector_store %arg3[%c0_46, %c0_47], %162 {strides = array<i32>} : memref<16x128xf32, #tpu.memory_space<vmem>>, vector<12x128xf32>,
    %164 = vector.shape_cast %159 : vector<1x1xf32> to vector<1x1xf32>
    %165 = vector.broadcast %164 : vector<1x1xf32> to vector<4x128xf32>
    %c12_48 = arith.constant 12 : index
    %c0_49 = arith.constant 0 : index
    %166 = vector.load %arg3[%c12_48, %c0_49] : memref<16x128xf32, #tpu.memory_space<vmem>>, vector<4x128xf32>
    tpu.vector_store %arg3[%c12_48, %c0_49], %165 {strides = array<i32>} : memref<16x128xf32, #tpu.memory_space<vmem>>, vector<4x128xf32>,
    return
  }
}

</mosaic_0001>

<bundles_post_ra>
// kernel: mobilenet10_forward.1
= control target key start
LH: loop header
LB: loop body
LE: loop exit
PB: predicated region body
PF: predicated region fallthrough
CT: control target
= control target key end

     0   :  { %vm52_vm0 = vcmask 1043456   ;;  %vm43_vm1 = vcmask 97280   ;;  %v2516_v2 = vmov 12   ;;  %vm2517_vm2 = vmmov 1   ;;  %s4066_s0 = inlined_call_operand.vmem [shape: f32[72,128], index: 0, kind: input, shape index: {}]   ;;  %s4067_s1 = inlined_call_operand.vmem [shape: f32[128,1024], index: 1, kind: input, shape index: {}]   ;;  %s4068_s2 = inlined_call_operand.vmem [shape: f32[1024,128], index: 2, kind: input, shape index: {}]   ;;  %s4069_s3 = inlined_call_operand.vmem [shape: f32[16,128], index: 3, kind: output, shape index: {}]  }
   0x1   :  { %v14_v0 = vld [vmem:[%s4066_s0] sm:$0xff]  ;;  %v15_v1 = vld [vmem:[%s4066_s0 + $0x8] sm:$0xf]  ;;  %2512 = vset.pattern.permute.xlu0 %v2516_v2  ;;  %2513 = vset.pattern.permute.xlu1 %v2516_v2  ;;  %vm2236_vm3 = vmpackc.low %vm52_vm0, %vm2517_vm2 }
   0x2   :  { %v2235_v3 = vpack.c.bf16 %v15_v1, %v14_v0  ;;  %v16_v4 = vld [vmem:[%s4066_s0 + $0x10] sm:$0xff]  ;;  %v17_v5 = vld [vmem:[%s4066_s0 + $0x18] sm:$0xff]  ;;  %v18_v6 = vld [vmem:[%s4066_s0 + $0x20] sm:$0xff] }
   0x3   :  { %2218 = vmatprep.mubr.msk.f32.mxu0 %vm43_vm1, %v16_v4  ;;  %25 = vperm.xlu0 %2512, %v16_v4   ;;  %v142_v7 = vld [vmem:[%s4067_s1 + $0x8] sm:$0xff]  ;;  %v144_v9 = vld [vmem:[%s4067_s1 + $0x18] sm:$0xff]  ;;  %v141_v14 = vld [vmem:[%s4067_s1] sm:$0xff] }
   0x4   :  { %2237 = vmatprep.subr.msk.bf16.mxu0 %vm2236_vm3, %v2235_v3  ;;  %35 = vperm.xlu1 %2513, %v18_v6   ;;  %v150_v8 = vld [vmem:[%s4067_s1 + $0x48] sm:$0xff]  ;;  %v152_v10 = vld [vmem:[%s4067_s1 + $0x58] sm:$0xff]  ;;  %v149_v15 = vld [vmem:[%s4067_s1 + $0x40] sm:$0xff] }
   0x5   :  { %2240 = vmatpush3.bf16.msk.msra.mxu0 %vm2236_vm3, %v2235_v3  ;;  %v19_v11 = vld [vmem:[%s4066_s0 + $0x28] sm:$0xff]  ;;  %v2241_v12 = vpack.c.bf16 %v150_v8, %v142_v7  ;;  %v2273_v13 = vpack.c.bf16 %v152_v10, %v144_v9  ;;  %v143_v16 = vld [vmem:[%s4067_s1 + $0x10] sm:$0xff]  ;;  %v2243_v17 = vpack.c.bf16 %v149_v15, %v141_v14  ;;  %v160_v23 = vld [vmem:[%s4067_s1 + $0x98] sm:$0xff] }
   0x6   :  { %v151_v18 = vld [vmem:[%s4067_s1 + $0x50] sm:$0xff]  ;;  %v158_v19 = vld [vmem:[%s4067_s1 + $0x88] sm:$0xff]  ;;  %v168_v24 = vld [vmem:[%s4067_s1 + $0xd8] sm:$0xff] }
   0x7   :  { %v166_v20 = vld [vmem:[%s4067_s1 + $0xc8] sm:$0xff]  ;;  %30 = vperm.xlu0 %2512, %v17_v5   ;;  %2242 = vmatprep.subr.bf16.mxu1 %v2241_v12  ;;  %v2275_v21 = vpack.c.bf16 %v151_v18, %v143_v16  ;;  %v157_v25 = vld [vmem:[%s4067_s1 + $0x80] sm:$0xff]  ;;  %v2277_v26 = vpack.c.bf16 %v168_v24, %v160_v23  ;;  %v159_v28 = vld [vmem:[%s4067_s1 + $0x90] sm:$0xff] }
   0x8   :  { %v2245_v22 = vpack.c.bf16 %v166_v20, %v158_v19  ;;  %2219 = vmatmul.mubr.msk.f32.vlgmr.msra.gmra.mrb[0].mxu0 %vm43_vm1, %v17_v5  ;;  %40 = vperm.xlu1 %2513, %v19_v11   ;;  %v165_v27 = vld [vmem:[%s4067_s1 + $0xc0] sm:$0xff]  ;;  %v167_v29 = vld [vmem:[%s4067_s1 + $0xd0] sm:$0xff]  ;;  %v174_v30 = vld [vmem:[%s4067_s1 + $0x108] sm:$0xff] }
   0x9   :  { %2221 = vmatprep.mubr.msk.f32.mxu0 %vm43_vm1, %v18_v6  ;;  %2274 = vmatprep.subr.bf16.mxu0 %v2273_v13  ;;  %v182_v31 = vld [vmem:[%s4067_s1 + $0x148] sm:$0xff]  ;;  %v176_v32 = vld [vmem:[%s4067_s1 + $0x118] sm:$0xff]  ;;  %v2247_v33 = vpack.c.bf16 %v165_v27, %v157_v25  ;;  %v2279_v34 = vpack.c.bf16 %v167_v29, %v159_v28  ;;  %v173_v36 = vld [vmem:[%s4067_s1 + $0x100] sm:$0xff] }
   0xa   :  { %2244 = vmatpush1.bf16.msra.mxu1 %v2243_v17  ;;  %2276 = vmatpush1.bf16.msra.mxu0 %v2275_v21  ;;  %v184_v35 = vld [vmem:[%s4067_s1 + $0x158] sm:$0xff]  ;;  %v181_v37 = vld [vmem:[%s4067_s1 + $0x140] sm:$0xff]  ;;  %v2249_v38 = vpack.c.bf16 %v182_v31, %v174_v30  ;;  %v175_v40 = vld [vmem:[%s4067_s1 + $0x110] sm:$0xff] }
   0xb   :  { %2246 = vmatprep.subr.bf16.mxu1 %v2245_v22  ;;  %2278 = vmatprep.subr.bf16.mxu0 %v2277_v26  ;;  %v2281_v39 = vpack.c.bf16 %v184_v35, %v176_v32  ;;  %v183_v41 = vld [vmem:[%s4067_s1 + $0x150] sm:$0xff]  ;;  %v190_v42 = vld [vmem:[%s4067_s1 + $0x188] sm:$0xff]  ;;  %v192_v44 = vld [vmem:[%s4067_s1 + $0x198] sm:$0xff]  ;;  %v2251_v46 = vpack.c.bf16 %v181_v37, %v173_v36 }
   0xc   :  { %2222 = vmatmul.mubr.msk.f32.gmra.mrb[2].mxu0 %vm43_vm1, %v19_v11  ;;  %v198_v43 = vld [vmem:[%s4067_s1 + $0x1c8] sm:$0xff]  ;;  %v200_v45 = vld [vmem:[%s4067_s1 + $0x1d8] sm:$0xff]  ;;  %v2283_v47 = vpack.c.bf16 %v183_v41, %v175_v40  ;;  %v189_v48 = vld [vmem:[%s4067_s1 + $0x180] sm:$0xff] }
   0xd   :  { %v197_v49 = vld [vmem:[%s4067_s1 + $0x1c0] sm:$0xff]  ;;  %v2253_v50 = vpack.c.bf16 %v198_v43, %v190_v42  ;;  %v2285_v51 = vpack.c.bf16 %v200_v45, %v192_v44  ;;  %v191_v52 = vld [vmem:[%s4067_s1 + $0x190] sm:$0xff]  ;;  %v206_v54 = vld [vmem:[%s4067_s1 + $0x208] sm:$0xff] }
   0xe   :  { %2248 = vmatpush1.bf16.msra.mxu1 %v2247_v33  ;;  %2280 = vmatpush1.bf16.msra.mxu0 %v2279_v34  ;;  %v199_v53 = vld [vmem:[%s4067_s1 + $0x1d0] sm:$0xff]  ;;  %v214_v55 = vld [vmem:[%s4067_s1 + $0x248] sm:$0xff]  ;;  %v208_v56 = vld [vmem:[%s4067_s1 + $0x218] sm:$0xff]  ;;  %v2255_v58 = vpack.c.bf16 %v197_v49, %v189_v48 }
   0xf   :  { %2250 = vmatprep.subr.bf16.mxu1 %v2249_v38  ;;  %2282 = vmatprep.subr.bf16.mxu0 %v2281_v39  ;;  %v216_v57 = vld [vmem:[%s4067_s1 + $0x258] sm:$0xff]  ;;  %v2287_v59 = vpack.c.bf16 %v199_v53, %v191_v52  ;;  %v205_v60 = vld [vmem:[%s4067_s1 + $0x200] sm:$0xff]  ;;  %v2257_v62 = vpack.c.bf16 %v214_v55, %v206_v54  ;;  %v207_v0 = vld [vmem:[%s4067_s1 + $0x210] sm:$0xff] }
  0x10   :  { %v213_v61 = vld [vmem:[%s4067_s1 + $0x240] sm:$0xff]  ;;  %v2289_v63 = vpack.c.bf16 %v216_v57, %v208_v56  ;;  %v215_v1 = vld [vmem:[%s4067_s1 + $0x250] sm:$0xff]  ;;  %v222_v2 = vld [vmem:[%s4067_s1 + $0x288] sm:$0xff] }
  0x11   :  { %v230_v3 = vld [vmem:[%s4067_s1 + $0x2c8] sm:$0xff]  ;;  %v224_v4 = vld [vmem:[%s4067_s1 + $0x298] sm:$0xff]  ;;  %v2259_v6 = vpack.c.bf16 %v213_v61, %v205_v60  ;;  %v2291_v7 = vpack.c.bf16 %v215_v1, %v207_v0  ;;  %v221_v8 = vld [vmem:[%s4067_s1 + $0x280] sm:$0xff] }
  0x12   :  { %2252 = vmatpush1.bf16.msra.mxu1 %v2251_v46  ;;  %2284 = vmatpush1.bf16.msra.mxu0 %v2283_v47  ;;  %v232_v5 = vld [vmem:[%s4067_s1 + $0x2d8] sm:$0xff]  ;;  %v229_v9 = vld [vmem:[%s4067_s1 + $0x2c0] sm:$0xff]  ;;  %v2261_v10 = vpack.c.bf16 %v230_v3, %v222_v2  ;;  %v223_v12 = vld [vmem:[%s4067_s1 + $0x290] sm:$0xff]  ;;  %v2518_v46 = vmov 0.0  }
  0x13   :  { %2254 = vmatprep.subr.bf16.mxu1 %v2253_v50  ;;  %2286 = vmatprep.subr.bf16.mxu0 %v2285_v51  ;;  %v2293_v11 = vpack.c.bf16 %v232_v5, %v224_v4  ;;  %v231_v13 = vld [vmem:[%s4067_s1 + $0x2d0] sm:$0xff]  ;;  %v238_v14 = vld [vmem:[%s4067_s1 + $0x308] sm:$0xff]  ;;  %v240_v16 = vld [vmem:[%s4067_s1 + $0x318] sm:$0xff]  ;;  %v2263_v18 = vpack.c.bf16 %v229_v9, %v221_v8 }
  0x14   :  { %v246_v15 = vld [vmem:[%s4067_s1 + $0x348] sm:$0xff]  ;;  %v248_v17 = vld [vmem:[%s4067_s1 + $0x358] sm:$0xff]  ;;  %v2295_v19 = vpack.c.bf16 %v231_v13, %v223_v12  ;;  %v237_v20 = vld [vmem:[%s4067_s1 + $0x300] sm:$0xff]  ;;  %333 = vmatprep.mubr.f32.mxu1 %v2518_v46  ;;  %422 = vmatprep.mubr.f32.mxu0 %v2518_v46 }
  0x15   :  { %v245_v21 = vld [vmem:[%s4067_s1 + $0x340] sm:$0xff]  ;;  %v2265_v22 = vpack.c.bf16 %v246_v15, %v238_v14  ;;  %v2297_v23 = vpack.c.bf16 %v248_v17, %v240_v16  ;;  %v239_v24 = vld [vmem:[%s4067_s1 + $0x310] sm:$0xff]  ;;  %v254_v26 = vld [vmem:[%s4067_s1 + $0x388] sm:$0xff] }
  0x16   :  { %2256 = vmatpush1.bf16.msra.mxu1 %v2255_v58  ;;  %2288 = vmatpush1.bf16.msra.mxu0 %v2287_v59  ;;  %v247_v25 = vld [vmem:[%s4067_s1 + $0x350] sm:$0xff]  ;;  %v262_v27 = vld [vmem:[%s4067_s1 + $0x3c8] sm:$0xff]  ;;  %v256_v28 = vld [vmem:[%s4067_s1 + $0x398] sm:$0xff]  ;;  %v2267_v30 = vpack.c.bf16 %v245_v21, %v237_v20 }
  0x17   :  { %2258 = vmatprep.subr.bf16.mxu1 %v2257_v62  ;;  %2290 = vmatprep.subr.bf16.mxu0 %v2289_v63  ;;  %v264_v29 = vld [vmem:[%s4067_s1 + $0x3d8] sm:$0xff]  ;;  %v2299_v31 = vpack.c.bf16 %v247_v25, %v239_v24  ;;  %v2269_v32 = vpack.c.bf16 %v262_v27, %v254_v26  ;;  %v253_v34 = vld [vmem:[%s4067_s1 + $0x380] sm:$0xff]  ;;  %v255_v37 = vld [vmem:[%s4067_s1 + $0x390] sm:$0xff] }
  0x18   :  { %v2301_v33 = vpack.c.bf16 %v264_v29, %v256_v28  ;;  %v261_v35 = vld [vmem:[%s4067_s1 + $0x3c0] sm:$0xff]  ;;  %v263_v38 = vld [vmem:[%s4067_s1 + $0x3d0] sm:$0xff]  ;;  %v146_v40 = vld [vmem:[%s4067_s1 + $0x28] sm:$0xff] }
  0x19   :  { %v2271_v36 = vpack.c.bf16 %v261_v35, %v253_v34  ;;  %v2303_v39 = vpack.c.bf16 %v263_v38, %v255_v37  ;;  %v154_v41 = vld [vmem:[%s4067_s1 + $0x68] sm:$0xff]  ;;  %v148_v42 = vld [vmem:[%s4067_s1 + $0x38] sm:$0xff]  ;;  %v145_v48 = vld [vmem:[%s4067_s1 + $0x20] sm:$0xff] }
  0x1a   :  { %2260 = vmatpush1.bf16.msra.mxu1 %v2259_v6  ;;  %2292 = vmatpush1.bf16.msra.mxu0 %v2291_v7  ;;  %v2305_v43 = vpack.c.bf16 %v154_v41, %v146_v40  ;;  %v156_v44 = vld [vmem:[%s4067_s1 + $0x78] sm:$0xff]  ;;  %v153_v49 = vld [vmem:[%s4067_s1 + $0x60] sm:$0xff]  ;;  %v147_v50 = vld [vmem:[%s4067_s1 + $0x30] sm:$0xff] }
  0x1b   :  { %2262 = vmatprep.subr.bf16.mxu1 %v2261_v10  ;;  %2294 = vmatprep.subr.bf16.mxu0 %v2293_v11  ;;  %v2337_v45 = vpack.c.bf16 %v156_v44, %v148_v42  ;;  %v155_v51 = vld [vmem:[%s4067_s1 + $0x70] sm:$0xff]  ;;  %v162_v52 = vld [vmem:[%s4067_s1 + $0xa8] sm:$0xff]  ;;  %v164_v55 = vld [vmem:[%s4067_s1 + $0xb8] sm:$0xff]  ;;  %v2307_v58 = vpack.c.bf16 %v153_v49, %v145_v48 }
  0x1c   :  { %v170_v54 = vld [vmem:[%s4067_s1 + $0xe8] sm:$0xff]  ;;  %v172_v56 = vld [vmem:[%s4067_s1 + $0xf8] sm:$0xff]  ;;  %v2339_v59 = vpack.c.bf16 %v155_v51, %v147_v50  ;;  %v161_v60 = vld [vmem:[%s4067_s1 + $0xa0] sm:$0xff] }
  0x1d   :  { %v169_v61 = vld [vmem:[%s4067_s1 + $0xe0] sm:$0xff]  ;;  %v163_v63 = vld [vmem:[%s4067_s1 + $0xb0] sm:$0xff]  ;;  %v178_v1 = vld [vmem:[%s4067_s1 + $0x128] sm:$0xff]  ;;  %v2309_v3 = vpack.c.bf16 %v170_v54, %v162_v52  ;;  %v2341_v4 = vpack.c.bf16 %v172_v56, %v164_v55 }
  0x1e   :  { %2264 = vmatpush1.bf16.msra.mxu1 %v2263_v18  ;;  %2296 = vmatpush1.bf16.msra.mxu0 %v2295_v19  ;;  %v171_v0 = vld [vmem:[%s4067_s1 + $0xf0] sm:$0xff]  ;;  %v186_v5 = vld [vmem:[%s4067_s1 + $0x168] sm:$0xff]  ;;  %v180_v6 = vld [vmem:[%s4067_s1 + $0x138] sm:$0xff]  ;;  %v2311_v10 = vpack.c.bf16 %v169_v61, %v161_v60 }
  0x1f   :  { %2266 = vmatprep.subr.bf16.mxu1 %v2265_v22  ;;  %2298 = vmatprep.subr.bf16.mxu0 %v2297_v23  ;;  %v188_v7 = vld [vmem:[%s4067_s1 + $0x178] sm:$0xff]  ;;  %v2343_v11 = vpack.c.bf16 %v171_v0, %v163_v63  ;;  %v177_v12 = vld [vmem:[%s4067_s1 + $0x120] sm:$0xff]  ;;  %v2313_v16 = vpack.c.bf16 %v186_v5, %v178_v1  ;;  %v179_v18 = vld [vmem:[%s4067_s1 + $0x130] sm:$0xff] }
  0x20   :  { %v185_v13 = vld [vmem:[%s4067_s1 + $0x160] sm:$0xff]  ;;  %v2345_v17 = vpack.c.bf16 %v188_v7, %v180_v6  ;;  %v187_v19 = vld [vmem:[%s4067_s1 + $0x170] sm:$0xff]  ;;  %v194_v20 = vld [vmem:[%s4067_s1 + $0x1a8] sm:$0xff] }
  0x21   :  { %v202_v21 = vld [vmem:[%s4067_s1 + $0x1e8] sm:$0xff]  ;;  %v196_v22 = vld [vmem:[%s4067_s1 + $0x1b8] sm:$0xff]  ;;  %v2315_v25 = vpack.c.bf16 %v185_v13, %v177_v12  ;;  %v2347_v26 = vpack.c.bf16 %v187_v19, %v179_v18  ;;  %v193_v27 = vld [vmem:[%s4067_s1 + $0x1a0] sm:$0xff] }
  0x22   :  { %2268 = vmatpush1.bf16.msra.mxu1 %v2267_v30  ;;  %2300 = vmatpush1.bf16.msra.mxu0 %v2299_v31  ;;  %v204_v23 = vld [vmem:[%s4067_s1 + $0x1f8] sm:$0xff]  ;;  %v201_v28 = vld [vmem:[%s4067_s1 + $0x1e0] sm:$0xff]  ;;  %v2317_v30 = vpack.c.bf16 %v202_v21, %v194_v20  ;;  %v210_v34 = vld [vmem:[%s4067_s1 + $0x228] sm:$0xff] }
  0x23   :  { %2270 = vmatprep.subr.bf16.mxu1 %v2269_v32  ;;  %2302 = vmatprep.subr.bf16.mxu0 %v2301_v33  ;;  %v2349_v31 = vpack.c.bf16 %v204_v23, %v196_v22  ;;  %v195_v32 = vld [vmem:[%s4067_s1 + $0x1b0] sm:$0xff]  ;;  %v218_v35 = vld [vmem:[%s4067_s1 + $0x268] sm:$0xff]  ;;  %v220_v37 = vld [vmem:[%s4067_s1 + $0x278] sm:$0xff] }
  0x24   :  { %v203_v33 = vld [vmem:[%s4067_s1 + $0x1f0] sm:$0xff]  ;;  %v209_v41 = vld [vmem:[%s4067_s1 + $0x220] sm:$0xff]  ;;  %v226_v48 = vld [vmem:[%s4067_s1 + $0x2a8] sm:$0xff] }
  0x25   :  { %v2351_v40 = vpack.c.bf16 %v203_v33, %v195_v32  ;;  %v217_v42 = vld [vmem:[%s4067_s1 + $0x260] sm:$0xff]  ;;  %v234_v49 = vld [vmem:[%s4067_s1 + $0x2e8] sm:$0xff]  ;;  %v228_v50 = vld [vmem:[%s4067_s1 + $0x2b8] sm:$0xff] }
  0x26   :  { %2272 = vmatpush1.bf16.msra.mxu1 %v2271_v36  ;;  %2304 = vmatpush1.bf16.msra.mxu0 %v2303_v39  ;;  %v212_v36 = vld [vmem:[%s4067_s1 + $0x238] sm:$0xff]  ;;  %v2319_v39 = vpack.c.bf16 %v201_v28, %v193_v27  ;;  %v2323_v52 = vpack.c.bf16 %v217_v42, %v209_v41  ;;  %v225_v54 = vld [vmem:[%s4067_s1 + $0x2a0] sm:$0xff]  ;;  %v2325_v56 = vpack.c.bf16 %v234_v49, %v226_v48  ;;  %v242_v60 = vld [vmem:[%s4067_s1 + $0x328] sm:$0xff] }
  0x27   :  { %2306 = vmatprep.subr.bf16.mxu1 %v2305_v43  ;;  %2338 = vmatprep.subr.bf16.mxu0 %v2337_v45  ;;  %v2321_v43 = vpack.c.bf16 %v218_v35, %v210_v34  ;;  %v2353_v44 = vpack.c.bf16 %v220_v37, %v212_v36  ;;  %v211_v45 = vld [vmem:[%s4067_s1 + $0x230] sm:$0xff]  ;;  %v236_v51 = vld [vmem:[%s4067_s1 + $0x2f8] sm:$0xff]  ;;  %v233_v55 = vld [vmem:[%s4067_s1 + $0x2e0] sm:$0xff] }
  0x28   :  { %v250_v61 = vld [vmem:[%s4067_s1 + $0x368] sm:$0xff]  ;;  %v244_v63 = vld [vmem:[%s4067_s1 + $0x338] sm:$0xff]  ;;  %v2327_v1 = vpack.c.bf16 %v233_v55, %v225_v54  ;;  %v243_v7 = vld [vmem:[%s4067_s1 + $0x330] sm:$0xff] }
  0x29   :  { %v252_v0 = vld [vmem:[%s4067_s1 + $0x378] sm:$0xff]  ;;  %v2329_v5 = vpack.c.bf16 %v250_v61, %v242_v60  ;;  %v265_v19 = vld [vmem:[%s4067_s1 + $0x3e0] sm:$0xff]  ;;  %v259_v20 = vld [vmem:[%s4067_s1 + $0x3b0] sm:$0xff] }
  0x2a   :  { %v2361_v6 = vpack.c.bf16 %v252_v0, %v244_v63  ;;  %v268_v12 = vld [vmem:[%s4067_s1 + $0x3f8] sm:$0xff]  ;;  %v267_v21 = vld [vmem:[%s4067_s1 + $0x3f0] sm:$0xff] }
  0x2b   :  { %v2367_v23 = vpack.c.bf16 %v267_v21, %v259_v20 }
  0x82   :  { %v26_v47 = vpop.permute.xlu0 %25 }
  0x83   :  { %v36_v8 = vpop.permute.xlu1 %35 }
  0x86   :  { %v31_v2 = vpop.permute.xlu0 %30 }
  0x87   :  { %v41_v29 = vpop.permute.xlu1 %40 }
  0xdb   :  { %v2220_v53 = vpop.f32.mrb[0].mxu0 }
  0xdc   :  { %v122_v57 = vpop.f32.mrb[1].mxu0  ;;  %v2827_v15 = vadd.f32 %v2220_v53, %v31_v2 }
  0xdd   :  { %v2799_v62 = vadd.f32 %v122_v57, %v26_v47  ;;  %v219_v47 = vld [vmem:[%s4067_s1 + $0x270] sm:$0xff]  ;;  %v2357_v57 = vpack.c.bf16 %v236_v51, %v228_v50 }
  0xde   :  { %4093 = vst [vmem:[#allocation3_spill] sm:$0xff] %v2827_v15  ;;  %v2355_v53 = vpack.c.bf16 %v219_v47, %v211_v45 }
  0xdf   :  { %4092 = vst [vmem:[#allocation2_spill] sm:$0xff] %v2799_v62  ;;  %334 = vmatmul.mubr.f32.vlgmr.msra.gmra.mrb[0].mxu1 %v2799_v62  ;;  %423 = vmatmul.mubr.f32.vlgmr.msra.gmra.mrb[4].mxu0 %v2799_v62  ;;  %v2223_v9 = vpop.f32.mrb[2].mxu0 }
  0xe0   :  { %2308 = vmatpush1.bf16.msra.mxu1 %v2307_v58  ;;  %2340 = vmatpush1.bf16.msra.mxu0 %v2339_v59  ;;  %v132_v14 = vpop.f32.mrb[3].mxu0  ;;  %v2881_v38 = vadd.f32 %v2223_v9, %v41_v29  ;;  %v227_v58 = vld [vmem:[%s4067_s1 + $0x2b0] sm:$0xff]  ;;  %v258_v9 = vld [vmem:[%s4067_s1 + $0x3a8] sm:$0xff] }
  0xe1   :  { %339 = vmatprep.mubr.f32.mxu1 %v2518_v46  ;;  %428 = vmatprep.mubr.f32.mxu0 %v2518_v46  ;;  %v2851_v24 = vadd.f32 %v132_v14, %v36_v8  ;;  %v235_v59 = vld [vmem:[%s4067_s1 + $0x2f0] sm:$0xff] }
  0xe2   :  { %2310 = vmatprep.subr.bf16.mxu1 %v2309_v3  ;;  %2342 = vmatprep.subr.bf16.mxu0 %v2341_v4  ;;  %4095 = vst [vmem:[#allocation5_spill] sm:$0xff] %v2881_v38  ;;  %v2359_v2 = vpack.c.bf16 %v235_v59, %v227_v58  ;;  %v241_v3 = vld [vmem:[%s4067_s1 + $0x320] sm:$0xff]  ;;  %v251_v8 = vld [vmem:[%s4067_s1 + $0x370] sm:$0xff] }
  0xe3   :  { %340 = vmatmul.mubr.f32.gmra.mrb[2].mxu1 %v2827_v15  ;;  %429 = vmatmul.mubr.f32.gmra.mrb[6].mxu0 %v2827_v15  ;;  %4094 = vst [vmem:[#allocation4_spill] sm:$0xff] %v2851_v24  ;;  %v249_v4 = vld [vmem:[%s4067_s1 + $0x360] sm:$0xff]  ;;  %v2363_v14 = vpack.c.bf16 %v251_v8, %v243_v7 }
  0xe4   :  { %2312 = vmatpush1.bf16.msra.mxu1 %v2311_v10  ;;  %2344 = vmatpush1.bf16.msra.mxu0 %v2343_v11  ;;  %v266_v10 = vld [vmem:[%s4067_s1 + $0x3e8] sm:$0xff]  ;;  %v260_v11 = vld [vmem:[%s4067_s1 + $0x3b8] sm:$0xff]  ;;  %v2331_v13 = vpack.c.bf16 %v249_v4, %v241_v3 }
  0xe5   :  { %2314 = vmatprep.subr.bf16.mxu1 %v2313_v16  ;;  %2346 = vmatprep.subr.bf16.mxu0 %v2345_v17  ;;  %v257_v16 = vld [vmem:[%s4067_s1 + $0x3a0] sm:$0xff]  ;;  %v2333_v17 = vpack.c.bf16 %v266_v10, %v258_v9  ;;  %v2365_v18 = vpack.c.bf16 %v268_v12, %v260_v11 }
  0xe6   :  { %345 = vmatprep.mubr.f32.mxu1 %v2518_v46  ;;  %434 = vmatprep.mubr.f32.mxu0 %v2518_v46  ;;  %v2335_v22 = vpack.c.bf16 %v265_v19, %v257_v16 }
  0xe7   :  { %346 = vmatmul.mubr.f32.gmra.mrb[4].mxu1 %v2851_v24  ;;  %435 = vmatmul.mubr.f32.gmra.mrb[8].mxu0 %v2851_v24 }
  0xe8   :  { %2316 = vmatpush1.bf16.msra.mxu1 %v2315_v25  ;;  %2348 = vmatpush1.bf16.msra.mxu0 %v2347_v26  ;;  %v2990_v25 = vld [vmem:[%s4066_s0 + $0x40] ss:$0 sm:$0xff] }
  0xe9   :  { %2318 = vmatprep.subr.bf16.mxu1 %v2317_v30  ;;  %2350 = vmatprep.subr.bf16.mxu0 %v2349_v31 }
  0xea   :  { %351 = vmatprep.mubr.f32.mxu1 %v2518_v46  ;;  %440 = vmatprep.mubr.f32.mxu0 %v2518_v46 }
  0xeb   :  { %352 = vmatmul.mubr.f32.gmra.mrb[6].mxu1 %v2881_v38  ;;  %441 = vmatmul.mubr.f32.gmra.mrb[10].mxu0 %v2881_v38 }
  0xec   :  { %2320 = vmatpush1.bf16.msra.mxu1 %v2319_v39  ;;  %2352 = vmatpush1.bf16.msra.mxu0 %v2351_v40 }
  0xed   :  { %2322 = vmatprep.subr.bf16.mxu1 %v2321_v43  ;;  %2354 = vmatprep.subr.bf16.mxu0 %v2353_v44 }
  0xee   :  { %511 = vmatprep.mubr.f32.mxu1 %v2518_v46  ;;  %600 = vmatprep.mubr.f32.mxu0 %v2518_v46 }
  0xf0   :  { %2324 = vmatpush1.bf16.msra.mxu1 %v2323_v52  ;;  %2356 = vmatpush1.bf16.msra.mxu0 %v2355_v53 }
  0xf1   :  { %2326 = vmatprep.subr.bf16.mxu1 %v2325_v56  ;;  %2358 = vmatprep.subr.bf16.mxu0 %v2357_v57 }
  0xf4   :  { %2328 = vmatpush1.bf16.msra.mxu1 %v2327_v1  ;;  %2360 = vmatpush1.bf16.msra.mxu0 %v2359_v2 }
  0xf5   :  { %2330 = vmatprep.subr.bf16.mxu1 %v2329_v5  ;;  %2362 = vmatprep.subr.bf16.mxu0 %v2361_v6 }
  0xf8   :  { %2332 = vmatpush1.bf16.msra.mxu1 %v2331_v13  ;;  %2364 = vmatpush1.bf16.msra.mxu0 %v2363_v14 }
  0xf9   :  { %2334 = vmatprep.subr.bf16.mxu1 %v2333_v17  ;;  %2366 = vmatprep.subr.bf16.mxu0 %v2365_v18 }
  0xfc   :  { %2336 = vmatpush1.bf16.msra.mxu1 %v2335_v22  ;;  %2368 = vmatpush1.bf16.msra.mxu0 %v2367_v23 }
  0xff   :  { %512 = vmatmul.mubr.f32.vlgmr.msra.gmra.mrb[8].mxu1 %v2799_v62  ;;  %601 = vmatmul.mubr.f32.vlgmr.msra.gmra.mrb[12].mxu0 %v2799_v62 }
 0x100   :  { %517 = vmatprep.mubr.f32.mxu1 %v2518_v46  ;;  %606 = vmatprep.mubr.f32.mxu0 %v2518_v46 }
 0x103   :  { %518 = vmatmul.mubr.f32.gmra.mrb[10].mxu1 %v2827_v15  ;;  %607 = vmatmul.mubr.f32.gmra.mrb[14].mxu0 %v2827_v15 }
 0x104   :  { %523 = vmatprep.mubr.f32.mxu1 %v2518_v46  ;;  %612 = vmatprep.mubr.f32.mxu0 %v2518_v46 }
 0x107   :  { %524 = vmatmul.mubr.f32.gmra.mrb[12].mxu1 %v2851_v24  ;;  %613 = vmatmul.mubr.f32.gmra.mrb[16].mxu0 %v2851_v24 }
 0x108   :  { %529 = vmatprep.mubr.f32.mxu1 %v2518_v46  ;;  %618 = vmatprep.mubr.f32.mxu0 %v2518_v46 }
 0x10b   :  { %530 = vmatmul.mubr.f32.gmra.mrb[14].mxu1 %v2881_v38  ;;  %619 = vmatmul.mubr.f32.gmra.mrb[18].mxu0 %v2881_v38 }
 0x1b2   :  { %v335_v26 = vpop.f32.mrb[0].mxu1  ;;  %v424_v27 = vpop.f32.mrb[4].mxu0 }
 0x1b3   :  { %v627_v28 = vmul.f32 2.0, %v335_v26  ;;  %v815_v29 = vmul.f32 2.0, %v424_v27  ;;  %v337_v30 = vpop.f32.mrb[1].mxu1  ;;  %v426_v31 = vpop.f32.mrb[5].mxu0 }
 0x1b4   :  { %v723_v32 = vmul.f32 2.0, %v337_v30  ;;  %v907_v40 = vmul.f32 2.0, %v426_v31 }
 0x1b5   :  { %v2993_v33 = vsub.f32 %v2990_v25, %v815_v29  ;;  %v2996_v46 = vsub.f32 %v2990_v25, %v627_v28 }
 0x1b6   :  { %v341_v34 = vpop.f32.mrb[2].mxu1  ;;  %v430_v35 = vpop.f32.mrb[6].mxu0  ;;  %v3001_v41 = vsub.f32 %v2990_v25, %v723_v32  ;;  %v3009_v51 = vsub.f32 %v2990_v25, %v907_v40 }
 0x1b7   :  { %823 = vmin.xlane.f32.xlu0 %v2993_v33  ;;  %v432_v36 = vpop.f32.mrb[7].mxu0  ;;  %639 = vmin.xlane.f32.xlu1 %v2996_v46  ;;  %v343_v37 = vpop.f32.mrb[3].mxu1  ;;  %v628_v50 = vmul.f32 2.0, %v341_v34  ;;  %v816_v59 = vmul.f32 2.0, %v430_v35 }
 0x1b8   :  { %v724_v39 = vmul.f32 2.0, %v343_v37  ;;  %v908_v42 = vmul.f32 2.0, %v432_v36 }
 0x1b9   :  { %v3020_v60 = vsub.f32 %v2990_v25, %v628_v50  ;;  %v3028_v0 = vsub.f32 %v2990_v25, %v816_v59 }
 0x1ba   :  { %v3004_v43 = vsub.f32 %v2990_v25, %v724_v39  ;;  %v347_v44 = vpop.f32.mrb[4].mxu1  ;;  %v436_v45 = vpop.f32.mrb[8].mxu0  ;;  %v3012_v52 = vsub.f32 %v2990_v25, %v908_v42 }
 0x1bb   :  { %731 = vmin.xlane.f32.xlu0 %v3001_v41  ;;  %v349_v47 = vpop.f32.mrb[5].mxu1  ;;  %v438_v48 = vpop.f32.mrb[9].mxu0  ;;  %v629_v63 = vmul.f32 2.0, %v347_v44  ;;  %v817_v2 = vmul.f32 2.0, %v436_v45 }
 0x1bc   :  { %733 = vmin.xlane.f32.xlu1 %v3004_v43  ;;  %v725_v49 = vmul.f32 2.0, %v349_v47  ;;  %v909_v57 = vmul.f32 2.0, %v438_v48 }
 0x1bd   :  { %v3033_v3 = vsub.f32 %v2990_v25, %v629_v63  ;;  %v3041_v7 = vsub.f32 %v2990_v25, %v817_v2 }
 0x1be   :  { %v442_v53 = vpop.f32.mrb[10].mxu0  ;;  %v353_v54 = vpop.f32.mrb[6].mxu1  ;;  %v3017_v58 = vsub.f32 %v2990_v25, %v725_v49  ;;  %v3025_v61 = vsub.f32 %v2990_v25, %v909_v57 }
 0x1bf   :  { %915 = vmin.xlane.f32.xlu0 %v3009_v51  ;;  %v444_v55 = vpop.f32.mrb[11].mxu0  ;;  %v355_v56 = vpop.f32.mrb[7].mxu1  ;;  %v630_v6 = vmul.f32 2.0, %v353_v54  ;;  %v818_v9 = vmul.f32 2.0, %v442_v53 }
 0x1c0   :  { %917 = vmin.xlane.f32.xlu1 %v3012_v52  ;;  %v726_v1 = vmul.f32 2.0, %v355_v56  ;;  %v910_v4 = vmul.f32 2.0, %v444_v55 }
 0x1c1   :  { %v3049_v10 = vsub.f32 %v2990_v25, %v630_v6  ;;  %v3053_v18 = vsub.f32 %v2990_v25, %v818_v9 }
 0x1c2   :  { %v3036_v5 = vsub.f32 %v2990_v25, %v726_v1  ;;  %v3044_v8 = vsub.f32 %v2990_v25, %v910_v4 }
 0x1c3   :  { %641 = vmin.xlane.f32.xlu0 %v3020_v60 }
 0x1c4   :  { %735 = vmin.xlane.f32.xlu1 %v3017_v58 }
 0x1c7   :  { %825 = vmin.xlane.f32.xlu0 %v3028_v0 }
 0x1c8   :  { %919 = vmin.xlane.f32.xlu1 %v3025_v61 }
 0x1cb   :  { %643 = vmin.xlane.f32.xlu0 %v3033_v3 }
 0x1cc   :  { %737 = vmin.xlane.f32.xlu1 %v3036_v5 }
 0x1cf   :  { %827 = vmin.xlane.f32.xlu0 %v3041_v7 }
 0x1d0   :  { %921 = vmin.xlane.f32.xlu1 %v3044_v8 }
 0x1d2   :  { %v513_v11 = vpop.f32.mrb[8].mxu1  ;;  %v602_v12 = vpop.f32.mrb[12].mxu0 }
 0x1d3   :  { %v515_v13 = vpop.f32.mrb[9].mxu1  ;;  %v604_v14 = vpop.f32.mrb[13].mxu0  ;;  %645 = vmin.xlane.f32.xlu0 %v3049_v10  ;;  %v999_v17 = vmul.f32 2.0, %v513_v11  ;;  %v1183_v27 = vmul.f32 2.0, %v602_v12 }
 0x1d4   :  { %v1091_v16 = vmul.f32 2.0, %v515_v13  ;;  %v1275_v19 = vmul.f32 2.0, %v604_v14 }
 0x1d5   :  { %v3061_v28 = vsub.f32 %v2990_v25, %v999_v17  ;;  %v3069_v37 = vsub.f32 %v2990_v25, %v1183_v27  ;;  %v625_v17 = vlaneseq }
 0x1d6   :  { %v519_v20 = vpop.f32.mrb[10].mxu1  ;;  %v608_v21 = vpop.f32.mrb[14].mxu0  ;;  %v3056_v22 = vsub.f32 %v2990_v25, %v1091_v16  ;;  %v3064_v32 = vsub.f32 %v2990_v25, %v1275_v19 }
 0x1d7   :  { %v521_v23 = vpop.f32.mrb[11].mxu1  ;;  %v610_v26 = vpop.f32.mrb[15].mxu0  ;;  %829 = vmin.xlane.f32.xlu0 %v3053_v18  ;;  %v1000_v36 = vmul.f32 2.0, %v519_v20  ;;  %v1184_v49 = vmul.f32 2.0, %v608_v21  ;;  %v3120_v19 = vand.u32 127, %v625_v17 }
 0x1d8   :  { %1099 = vmin.xlane.f32.xlu1 %v3056_v22  ;;  %v1092_v29 = vmul.f32 2.0, %v521_v23  ;;  %v1276_v39 = vmul.f32 2.0, %v610_v26 }
 0x1d9   :  { %v3077_v50 = vsub.f32 %v2990_v25, %v1000_v36  ;;  %v3088_v57 = vsub.f32 %v2990_v25, %v1184_v49  ;;  %4096 = vst [vmem:[#allocation6_spill] sm:$0xff] %v3120_v19 }
 0x1da   :  { %v525_v30 = vpop.f32.mrb[12].mxu1  ;;  %v614_v31 = vpop.f32.mrb[16].mxu0  ;;  %v3072_v44 = vsub.f32 %v2990_v25, %v1092_v29  ;;  %v3083_v55 = vsub.f32 %v2990_v25, %v1276_v39 }
 0x1db   :  { %v527_v34 = vpop.f32.mrb[13].mxu1  ;;  %v616_v35 = vpop.f32.mrb[17].mxu0  ;;  %1007 = vmin.xlane.f32.xlu0 %v3061_v28  ;;  %v1001_v56 = vmul.f32 2.0, %v525_v30  ;;  %v1185_v1 = vmul.f32 2.0, %v614_v31 }
 0x1dc   :  { %1283 = vmin.xlane.f32.xlu1 %v3064_v32  ;;  %v1093_v54 = vmul.f32 2.0, %v527_v34  ;;  %v1277_v59 = vmul.f32 2.0, %v616_v35 }
 0x1dd   :  { %v3096_v2 = vsub.f32 %v2990_v25, %v1001_v56  ;;  %v3104_v11 = vsub.f32 %v2990_v25, %v1185_v1 }
 0x1de   :  { %v531_v40 = vpop.f32.mrb[14].mxu1  ;;  %v620_v42 = vpop.f32.mrb[18].mxu0  ;;  %v3091_v63 = vsub.f32 %v2990_v25, %v1093_v54  ;;  %v3099_v6 = vsub.f32 %v2990_v25, %v1277_v59 }
 0x1df   :  { %v1186_v45 = vmul.f32 2.0, %v620_v42  ;;  %v533_v47 = vpop.f32.mrb[15].mxu1  ;;  %v622_v48 = vpop.f32.mrb[19].mxu0  ;;  %1191 = vmin.xlane.f32.xlu0 %v3069_v37  ;;  %v1002_v9 = vmul.f32 2.0, %v531_v40 }
 0x1e0   :  { %1101 = vmin.xlane.f32.xlu1 %v3072_v44  ;;  %v1094_v4 = vmul.f32 2.0, %v533_v47  ;;  %v1278_v12 = vmul.f32 2.0, %v622_v48 }
 0x1e1   :  { %v3080_v53 = vsub.f32 %v2990_v25, %v1186_v45  ;;  %v3112_v14 = vsub.f32 %v2990_v25, %v1002_v9 }
 0x1e2   :  { %v3107_v13 = vsub.f32 %v2990_v25, %v1094_v4  ;;  %v3115_v16 = vsub.f32 %v2990_v25, %v1278_v12 }
 0x1e3   :  { %1009 = vmin.xlane.f32.xlu0 %v3077_v50 }
 0x1e4   :  { %1285 = vmin.xlane.f32.xlu1 %v3083_v55 }
 0x1e7   :  { %1193 = vmin.xlane.f32.xlu0 %v3088_v57 }
 0x1e8   :  { %1103 = vmin.xlane.f32.xlu1 %v3091_v63 }
 0x1eb   :  { %1011 = vmin.xlane.f32.xlu0 %v3096_v2 }
 0x1ec   :  { %1287 = vmin.xlane.f32.xlu1 %v3099_v6 }
 0x1ef   :  { %1195 = vmin.xlane.f32.xlu0 %v3104_v11 }
 0x1f0   :  { %1105 = vmin.xlane.f32.xlu1 %v3107_v13 }
 0x1f3   :  { %1013 = vmin.xlane.f32.xlu0 %v3112_v14 }
 0x1f4   :  { %1289 = vmin.xlane.f32.xlu1 %v3115_v16 }
 0x1f7   :  { %1197 = vmin.xlane.f32.xlu0 %v3080_v53 }
 0x244   :  { %v824_v20 = vpop.xlane.xlu0 %823  ;;  %v640_v21 = vpop.xlane.xlu1 %639 }
 0x245   :  { %vm831_vm4 = vcmp.le.f32.partialorder %v2993_v33, %v824_v20  ;;  %vm647_vm5 = vcmp.le.f32.partialorder %v2996_v46, %v640_v21 }
 0x246   :  { %v3125_v23 = vsel %vm831_vm4, %v3120_v19, 2147483647  ;;  %v3128_v25 = vsel %vm647_vm5, %v3120_v19, 2147483647 }
 0x247   :  { %v656_v26 = vshra.s32 %v3128_v25, 16  ;;  %v840_v31 = vshra.s32 %v3125_v23, 16 }
 0x248   :  { %v732_v27 = vpop.xlane.xlu0 %731 }
 0x249   :  { %vm739_vm6 = vcmp.le.f32.partialorder %v3001_v41, %v732_v27  ;;  %v734_v29 = vpop.xlane.xlu1 %733  ;;  %v3132_v30 = vcvt.s32.f32 %v656_v26  ;;  %v3142_v36 = vcvt.s32.f32 %v840_v31 }
 0x24a   :  { %v3136_v33 = vsel %vm739_vm6, %v3120_v19, 2147483647  ;;  %vm740_vm7 = vcmp.le.f32.partialorder %v3004_v43, %v734_v29 }
 0x24b   :  { %659 = vmin.xlane.f32.xlu0 %v3132_v30  ;;  %v748_v46 = vshra.s32 %v3136_v33, 16  ;;  %v3147_v39 = vsel %vm740_vm7, %v3120_v19, 2147483647 }
 0x24c   :  { %v916_v34 = vpop.xlane.xlu0 %915  ;;  %v762_v47 = vshra.s32 %v3147_v39, 16 }
 0x24d   :  { %vm923_vm8 = vcmp.le.f32.partialorder %v3009_v51, %v916_v34  ;;  %v918_v35 = vpop.xlane.xlu1 %917  ;;  %v3144_v41 = vcvt.s32.f32 %v748_v46 }
 0x24e   :  { %v3150_v40 = vsel %vm923_vm8, %v3120_v19, 2147483647  ;;  %vm924_vm9 = vcmp.le.f32.partialorder %v3012_v52, %v918_v35  ;;  %v3172_v59 = vcvt.s32.f32 %v762_v47 }
 0x24f   :  { %843 = vmin.xlane.f32.xlu0 %v3142_v36  ;;  %751 = vmin.xlane.f32.xlu1 %v3144_v41  ;;  %v932_v43 = vshra.s32 %v3150_v40, 16  ;;  %v3161_v48 = vsel %vm924_vm9, %v3120_v19, 2147483647 }
 0x250   :  { %v642_v51 = vpop.xlane.xlu0 %641  ;;  %v946_v1 = vshra.s32 %v3161_v48, 16 }
 0x251   :  { %vm648_vm10 = vcmp.le.f32.partialorder %v3020_v60, %v642_v51  ;;  %v736_v42 = vpop.xlane.xlu1 %735  ;;  %v3157_v45 = vcvt.s32.f32 %v932_v43 }
 0x252   :  { %v3164_v49 = vsel %vm648_vm10, %v3120_v19, 2147483647  ;;  %vm741_vm11 = vcmp.le.f32.partialorder %v3017_v58, %v736_v42  ;;  %v3188_v20 = vcvt.s32.f32 %v946_v1 }
 0x253   :  { %935 = vmin.xlane.f32.xlu1 %v3157_v45  ;;  %v670_v52 = vshra.s32 %v3164_v49, 16  ;;  %v3176_v4 = vsel %vm741_vm11, %v3120_v19, 2147483647 }
 0x254   :  { %v826_v54 = vpop.xlane.xlu0 %825  ;;  %v776_v21 = vshra.s32 %v3176_v4, 16 }
 0x255   :  { %vm832_vm12 = vcmp.le.f32.partialorder %v3028_v0, %v826_v54  ;;  %v920_v60 = vpop.xlane.xlu1 %919  ;;  %v3170_v56 = vcvt.s32.f32 %v670_v52 }
 0x256   :  { %v3179_v9 = vsel %vm832_vm12, %v3120_v19, 2147483647  ;;  %vm925_vm13 = vcmp.le.f32.partialorder %v3025_v61, %v920_v60  ;;  %v3204_v46 = vcvt.s32.f32 %v776_v21 }
 0x257   :  { %673 = vmin.xlane.f32.xlu0 %v3170_v56  ;;  %765 = vmin.xlane.f32.xlu1 %v3172_v59  ;;  %v854_v58 = vshra.s32 %v3179_v9, 16  ;;  %v3192_v26 = vsel %vm925_vm13, %v3120_v19, 2147483647 }
 0x258   :  { %v644_v0 = vpop.xlane.xlu0 %643  ;;  %v960_v34 = vshra.s32 %v3192_v26, 16 }
 0x259   :  { %vm649_vm14 = vcmp.le.f32.partialorder %v3033_v3, %v644_v0  ;;  %v738_v12 = vpop.xlane.xlu1 %737  ;;  %v3186_v17 = vcvt.s32.f32 %v854_v58 }
 0x25a   :  { %v3195_v61 = vsel %vm649_vm14, %v3120_v19, 2147483647  ;;  %vm742_vm15 = vcmp.le.f32.partialorder %v3036_v5, %v738_v12  ;;  %v3220_v42 = vcvt.s32.f32 %v960_v34 }
 0x25b   :  { %857 = vmin.xlane.f32.xlu0 %v3186_v17  ;;  %949 = vmin.xlane.f32.xlu1 %v3188_v20  ;;  %v684_v3 = vshra.s32 %v3195_v61, 16  ;;  %v3208_v35 = vsel %vm742_vm15, %v3120_v19, 2147483647 }
 0x25c   :  { %v828_v27 = vpop.xlane.xlu0 %827  ;;  %v790_v47 = vshra.s32 %v3208_v35, 16 }
 0x25d   :  { %vm833_vm0 = vcmp.le.f32.partialorder %v3041_v7, %v828_v27  ;;  %v922_v29 = vpop.xlane.xlu1 %921  ;;  %v3202_v31 = vcvt.s32.f32 %v684_v3 }
 0x25e   :  { %v3211_v5 = vsel %vm833_vm0, %v3120_v19, 2147483647  ;;  %vm926_vm1 = vcmp.le.f32.partialorder %v3044_v8, %v922_v29  ;;  %v3235_v58 = vcvt.s32.f32 %v790_v47 }
 0x25f   :  { %687 = vmin.xlane.f32.xlu0 %v3202_v31  ;;  %779 = vmin.xlane.f32.xlu1 %v3204_v46  ;;  %v868_v7 = vshra.s32 %v3211_v5, 16  ;;  %v3224_v52 = vsel %vm926_vm1, %v3120_v19, 2147483647 }
 0x260   :  { %v646_v43 = vpop.xlane.xlu0 %645  ;;  %v974_v0 = vshra.s32 %v3224_v52, 16 }
 0x261   :  { %vm650_vm2 = vcmp.le.f32.partialorder %v3049_v10, %v646_v43  ;;  %v3218_v51 = vcvt.s32.f32 %v868_v7 }
 0x262   :  { %v3227_v8 = vsel %vm650_vm2, %v3120_v19, 2147483647  ;;  %v3251_v34 = vcvt.s32.f32 %v974_v0 }
 0x263   :  { %871 = vmin.xlane.f32.xlu0 %v3218_v51  ;;  %963 = vmin.xlane.f32.xlu1 %v3220_v42  ;;  %v698_v54 = vshra.s32 %v3227_v8, 16 }
 0x264   :  { %v830_v60 = vpop.xlane.xlu0 %829 }
 0x265   :  { %vm834_vm3 = vcmp.le.f32.partialorder %v3053_v18, %v830_v60  ;;  %v1100_v10 = vpop.xlane.xlu1 %1099  ;;  %v3233_v1 = vcvt.s32.f32 %v698_v54 }
 0x266   :  { %v3239_v12 = vsel %vm834_vm3, %v3120_v19, 2147483647  ;;  %vm1107_vm4 = vcmp.le.f32.partialorder %v3056_v22, %v1100_v10 }
 0x267   :  { %v3243_v21 = vsel %vm1107_vm4, %v3120_v19, 2147483647  ;;  %701 = vmin.xlane.f32.xlu0 %v3233_v1  ;;  %793 = vmin.xlane.f32.xlu1 %v3235_v58  ;;  %v882_v18 = vshra.s32 %v3239_v12, 16 }
 0x268   :  { %v1008_v3 = vpop.xlane.xlu0 %1007  ;;  %v1116_v7 = vshra.s32 %v3243_v21, 16 }
 0x269   :  { %vm1015_vm5 = vcmp.le.f32.partialorder %v3061_v28, %v1008_v3  ;;  %v1284_v27 = vpop.xlane.xlu1 %1283  ;;  %v3249_v29 = vcvt.s32.f32 %v882_v18 }
 0x26a   :  { %v3255_v22 = vsel %vm1015_vm5, %v3120_v19, 2147483647  ;;  %vm1291_vm6 = vcmp.le.f32.partialorder %v3064_v32, %v1284_v27  ;;  %v3267_v10 = vcvt.s32.f32 %v1116_v7 }
 0x26b   :  { %v3259_v43 = vsel %vm1291_vm6, %v3120_v19, 2147483647  ;;  %885 = vmin.xlane.f32.xlu0 %v3249_v29  ;;  %977 = vmin.xlane.f32.xlu1 %v3251_v34  ;;  %v1024_v28 = vshra.s32 %v3255_v22, 16 }
 0x26c   :  { %v1192_v47 = vpop.xlane.xlu0 %1191  ;;  %v1300_v0 = vshra.s32 %v3259_v43, 16 }
 0x26d   :  { %vm1199_vm7 = vcmp.le.f32.partialorder %v3069_v37, %v1192_v47  ;;  %v1102_v54 = vpop.xlane.xlu1 %1101  ;;  %v3265_v60 = vcvt.s32.f32 %v1024_v28 }
 0x26e   :  { %v3271_v32 = vsel %vm1199_vm7, %v3120_v19, 2147483647  ;;  %vm1108_vm8 = vcmp.le.f32.partialorder %v3072_v44, %v1102_v54  ;;  %v3283_v28 = vcvt.s32.f32 %v1300_v0 }
 0x26f   :  { %v3275_v18 = vsel %vm1108_vm8, %v3120_v19, 2147483647  ;;  %1027 = vmin.xlane.f32.xlu0 %v3265_v60  ;;  %1119 = vmin.xlane.f32.xlu1 %v3267_v10  ;;  %v1208_v37 = vshra.s32 %v3271_v32, 16 }
 0x270   :  { %v1010_v3 = vpop.xlane.xlu0 %1009  ;;  %v1130_v47 = vshra.s32 %v3275_v18, 16 }
 0x271   :  { %vm1016_vm9 = vcmp.le.f32.partialorder %v3077_v50, %v1010_v3  ;;  %v1286_v27 = vpop.xlane.xlu1 %1285  ;;  %v3281_v7 = vcvt.s32.f32 %v1208_v37 }
 0x272   :  { %v3287_v44 = vsel %vm1016_vm9, %v3120_v19, 2147483647  ;;  %vm1292_vm10 = vcmp.le.f32.partialorder %v3083_v55, %v1286_v27  ;;  %v3299_v38 = vcvt.s32.f32 %v1130_v47 }
 0x273   :  { %v3291_v54 = vsel %vm1292_vm10, %v3120_v19, 2147483647  ;;  %1211 = vmin.xlane.f32.xlu0 %v3281_v7  ;;  %1303 = vmin.xlane.f32.xlu1 %v3283_v28  ;;  %v1038_v50 = vshra.s32 %v3287_v44, 16 }
 0x274   :  { %v1194_v37 = vpop.xlane.xlu0 %1193  ;;  %4097 = vst [vmem:[#allocation7_spill] sm:$0xff] %v3299_v38  ;;  %v1314_v24 = vshra.s32 %v3291_v54, 16 }
 0x275   :  { %vm1200_vm11 = vcmp.le.f32.partialorder %v3088_v57, %v1194_v37  ;;  %v1104_v0 = vpop.xlane.xlu1 %1103  ;;  %v3297_v3 = vcvt.s32.f32 %v1038_v50 }
 0x276   :  { %v3303_v55 = vsel %vm1200_vm11, %v3120_v19, 2147483647  ;;  %vm1109_vm12 = vcmp.le.f32.partialorder %v3091_v63, %v1104_v0  ;;  %v3315_v15 = vcvt.s32.f32 %v1314_v24 }
 0x277   :  { %v3307_v27 = vsel %vm1109_vm12, %v3120_v19, 2147483647  ;;  %1041 = vmin.xlane.f32.xlu0 %v3297_v3  ;;  %1133 = vmin.xlane.f32.xlu1 %v3299_v38  ;;  %v1222_v57 = vshra.s32 %v3303_v55, 16 }
 0x278   :  { %4098 = vst [vmem:[#allocation8_spill] sm:$0xff] %v3307_v27  ;;  %v1012_v50 = vpop.xlane.xlu0 %1011  ;;  %4099 = vst [vmem:[#allocation9_spill] sm:$0xff] %v3315_v15  ;;  %v1144_v62 = vshra.s32 %v3307_v27, 16 }
 0x279   :  { %vm1017_vm13 = vcmp.le.f32.partialorder %v3096_v2, %v1012_v50  ;;  %v1288_v47 = vpop.xlane.xlu1 %1287  ;;  %v3313_v37 = vcvt.s32.f32 %v1222_v57 }
 0x27a   :  { %v3319_v63 = vsel %vm1017_vm13, %v3120_v19, 2147483647  ;;  %vm1293_vm14 = vcmp.le.f32.partialorder %v3099_v6, %v1288_v47  ;;  %v3331_v27 = vcvt.s32.f32 %v1144_v62 }
 0x27b   :  { %v3323_v0 = vsel %vm1293_vm14, %v3120_v19, 2147483647  ;;  %1225 = vmin.xlane.f32.xlu0 %v3313_v37  ;;  %1317 = vmin.xlane.f32.xlu1 %v3315_v15  ;;  %v1052_v2 = vshra.s32 %v3319_v63, 16 }
 0x27c   :  { %4100 = vst [vmem:[#allocation10_spill] sm:$0xff] %v3323_v0  ;;  %v1196_v57 = vpop.xlane.xlu0 %1195  ;;  %4102 = vst [vmem:[#allocation12_spill] sm:$0xff] %v3331_v27  ;;  %v1328_v38 = vshra.s32 %v3323_v0, 16 }
 0x27d   :  { %vm1201_vm15 = vcmp.le.f32.partialorder %v3104_v11, %v1196_v57  ;;  %v1106_v24 = vpop.xlane.xlu1 %1105  ;;  %v3329_v50 = vcvt.s32.f32 %v1052_v2 }
 0x27e   :  { %v3335_v6 = vsel %vm1201_vm15, %v3120_v19, 2147483647  ;;  %vm1110_vm0 = vcmp.le.f32.partialorder %v3107_v13, %v1106_v24  ;;  %v3347_v0 = vcvt.s32.f32 %v1328_v38 }
 0x27f   :  { %4101 = vst [vmem:[#allocation11_spill] sm:$0xff] %v3329_v50  ;;  %v3339_v47 = vsel %vm1110_vm0, %v3120_v19, 2147483647  ;;  %1055 = vmin.xlane.f32.xlu0 %v3329_v50  ;;  %1147 = vmin.xlane.f32.xlu1 %v3331_v27  ;;  %v1236_v11 = vshra.s32 %v3335_v6, 16  ;;  %v1374_v50 = vld [vmem:[%s4068_s2 + $0x38] sm:$0xff] }
 0x280   :  { %4103 = vst [vmem:[#allocation13_spill] sm:$0xff] %v3339_v47  ;;  %v1014_v2 = vpop.xlane.xlu0 %1013  ;;  %4105 = vst [vmem:[#allocation15_spill] sm:$0xff] %v3347_v0  ;;  %v1158_v15 = vshra.s32 %v3339_v47, 16 }
 0x281   :  { %vm1018_vm1 = vcmp.le.f32.partialorder %v3112_v14, %v1014_v2  ;;  %v1290_v62 = vpop.xlane.xlu1 %1289  ;;  %v3345_v57 = vcvt.s32.f32 %v1236_v11 }
 0x282   :  { %v3351_v13 = vsel %vm1018_vm1, %v3120_v19, 2147483647  ;;  %vm1294_vm2 = vcmp.le.f32.partialorder %v3115_v16, %v1290_v62  ;;  %v3363_v2 = vcvt.s32.f32 %v1158_v15  ;;  %v1383_v15 = vld [vmem:[%s4068_s2 + $0x80] sm:$0xff] }
 0x283   :  { %4104 = vst [vmem:[#allocation14_spill] sm:$0xff] %v3345_v57  ;;  %4106 = vst [vmem:[#allocation16_spill] sm:$0xff] %v3351_v13  ;;  %v3355_v24 = vsel %vm1294_vm2, %v3120_v19, 2147483647  ;;  %1239 = vmin.xlane.f32.xlu0 %v3345_v57  ;;  %1331 = vmin.xlane.f32.xlu1 %v3347_v0  ;;  %v1066_v14 = vshra.s32 %v3351_v13, 16 }
 0x284   :  { %4107 = vst [vmem:[#allocation17_spill] sm:$0xff] %v3355_v24  ;;  %v1198_v11 = vpop.xlane.xlu0 %1197  ;;  %4109 = vst [vmem:[#allocation19_spill] sm:$0xff] %v3363_v2  ;;  %v1342_v47 = vshra.s32 %v3355_v24, 16 }
 0x285   :  { %vm1202_vm3 = vcmp.le.f32.partialorder %v3080_v53, %v1198_v11  ;;  %v3361_v38 = vcvt.s32.f32 %v1066_v14  ;;  %v1384_v53 = vld [vmem:[%s4068_s2 + $0x88] sm:$0xff]  ;;  %v1367_v14 = vld [vmem:[%s4068_s2] sm:$0xff] }
 0x286   :  { %v3367_v16 = vsel %vm1202_vm3, %v3120_v19, 2147483647  ;;  %v3374_v57 = vcvt.s32.f32 %v1342_v47  ;;  %v2369_v11 = vpack.c.bf16 %v1384_v53, %v1383_v15  ;;  %v1368_v47 = vld [vmem:[%s4068_s2 + $0x8] sm:$0xff]  ;;  %v1386_v19 = vld [vmem:[%s4068_s2 + $0x98] sm:$0xff]  ;;  %v1369_v53 = vld [vmem:[%s4068_s2 + $0x10] sm:$0xff] }
 0x287   :  { %4108 = vst [vmem:[#allocation18_spill] sm:$0xff] %v3361_v38  ;;  %4110 = vst [vmem:[#allocation20_spill] sm:$0xff] %v3367_v16  ;;  %1069 = vmin.xlane.f32.xlu0 %v3361_v38  ;;  %1161 = vmin.xlane.f32.xlu1 %v3363_v2  ;;  %v1250_v62 = vshra.s32 %v3367_v16, 16  ;;  %v1415_v2 = vld [vmem:[%s4068_s2 + $0x180] sm:$0xff]  ;;  %v1416_v15 = vld [vmem:[%s4068_s2 + $0x188] sm:$0xff] }
 0x288   :  { %4112 = vst [vmem:[#allocation22_spill] sm:$0xff] %v3374_v57  ;;  %2370 = vmatprep.subr.bf16.mxu1 %v2369_v11  ;;  %v2401_v38 = vpack.c.bf16 %v1416_v15, %v1415_v2  ;;  %v1370_v16 = vld [vmem:[%s4068_s2 + $0x18] sm:$0xff]  ;;  %v1387_v11 = vld [vmem:[%s4068_s2 + $0xa0] sm:$0xff]  ;;  %v1388_v2 = vld [vmem:[%s4068_s2 + $0xa8] sm:$0xff] }
 0x289   :  { %v3372_v0 = vcvt.s32.f32 %v1250_v62  ;;  %v1385_v62 = vld [vmem:[%s4068_s2 + $0x90] sm:$0xff]  ;;  %v2377_v24 = vpack.c.bf16 %v1388_v2, %v1387_v11  ;;  %v1390_v2 = vld [vmem:[%s4068_s2 + $0xb8] sm:$0xff] }
 0x28a   :  { %v1417_v15 = vld [vmem:[%s4068_s2 + $0x190] sm:$0xff]  ;;  %2402 = vmatprep.subr.bf16.mxu0 %v2401_v38  ;;  %v1402_v38 = vld [vmem:[%s4068_s2 + $0x118] sm:$0xff] }
 0x28b   :  { %4111 = vst [vmem:[#allocation21_spill] sm:$0xff] %v3372_v0  ;;  %1253 = vmin.xlane.f32.xlu0 %v3372_v0  ;;  %1345 = vmin.xlane.f32.xlu1 %v3374_v57  ;;  %v2371_v57 = vpack.c.bf16 %v1368_v47, %v1367_v14  ;;  %v2373_v0 = vpack.c.bf16 %v1386_v19, %v1385_v62  ;;  %v1399_v19 = vld [vmem:[%s4068_s2 + $0x100] sm:$0xff]  ;;  %v1400_v14 = vld [vmem:[%s4068_s2 + $0x108] sm:$0xff] }
 0x28c   :  { %v2375_v47 = vpack.c.bf16 %v1370_v16, %v1369_v53  ;;  %v2403_v62 = vpack.c.bf16 %v1400_v14, %v1399_v19  ;;  %v1371_v16 = vld [vmem:[%s4068_s2 + $0x20] sm:$0xff]  ;;  %v1372_v53 = vld [vmem:[%s4068_s2 + $0x28] sm:$0xff]  ;;  %v1389_v14 = vld [vmem:[%s4068_s2 + $0xb0] sm:$0xff] }
 0x28d   :  { %2372 = vmatpush3.bf16.msra.mxu1 %v2371_v57  ;;  %v1418_v57 = vld [vmem:[%s4068_s2 + $0x198] sm:$0xff]  ;;  %v2381_v27 = vpack.c.bf16 %v1390_v2, %v1389_v14 }
 0x28e   :  { %2374 = vmatprep.subr.bf16.mxu1 %v2373_v0  ;;  %2404 = vmatpush3.bf16.msra.mxu0 %v2403_v62  ;;  %v2405_v19 = vpack.c.bf16 %v1418_v57, %v1417_v15  ;;  %v1401_v0 = vld [vmem:[%s4068_s2 + $0x110] sm:$0xff]  ;;  %v1419_v62 = vld [vmem:[%s4068_s2 + $0x1a0] sm:$0xff]  ;;  %v1420_v15 = vld [vmem:[%s4068_s2 + $0x1a8] sm:$0xff]  ;;  %v2379_v57 = vpack.c.bf16 %v1372_v53, %v1371_v16 }
 0x28f   :  { %v2407_v11 = vpack.c.bf16 %v1402_v38, %v1401_v0  ;;  %v2409_v13 = vpack.c.bf16 %v1420_v15, %v1419_v62  ;;  %v1373_v0 = vld [vmem:[%s4068_s2 + $0x30] sm:$0xff]  ;;  %v1403_v38 = vld [vmem:[%s4068_s2 + $0x120] sm:$0xff]  ;;  %v1422_v14 = vld [vmem:[%s4068_s2 + $0x1b8] sm:$0xff] }
 0x290   :  { %2406 = vmatprep.subr.bf16.mxu0 %v2405_v19  ;;  %v1391_v16 = vld [vmem:[%s4068_s2 + $0xc0] sm:$0xff]  ;;  %v1392_v19 = vld [vmem:[%s4068_s2 + $0xc8] sm:$0xff]  ;;  %v1405_v62 = vld [vmem:[%s4068_s2 + $0x130] sm:$0xff]  ;;  %v2383_v15 = vpack.c.bf16 %v1374_v50, %v1373_v0 }
 0x291   :  { %2376 = vmatpush3.bf16.msra.mxu1 %v2375_v47  ;;  %v1404_v47 = vld [vmem:[%s4068_s2 + $0x128] sm:$0xff] }
 0x292   :  { %2378 = vmatprep.subr.bf16.mxu1 %v2377_v24  ;;  %2408 = vmatpush3.bf16.msra.mxu0 %v2407_v11  ;;  %v2411_v53 = vpack.c.bf16 %v1404_v47, %v1403_v38  ;;  %v1421_v24 = vld [vmem:[%s4068_s2 + $0x1b0] sm:$0xff]  ;;  %v1406_v11 = vld [vmem:[%s4068_s2 + $0x138] sm:$0xff]  ;;  %v1423_v38 = vld [vmem:[%s4068_s2 + $0x1c0] sm:$0xff]  ;;  %v2385_v47 = vpack.c.bf16 %v1392_v19, %v1391_v16 }
 0x293   :  { %2410 = vmatprep.subr.bf16.mxu0 %v2409_v13  ;;  %v2413_v2 = vpack.c.bf16 %v1422_v14, %v1421_v24  ;;  %v1375_v13 = vld [vmem:[%s4068_s2 + $0x40] sm:$0xff]  ;;  %v1376_v24 = vld [vmem:[%s4068_s2 + $0x48] sm:$0xff]  ;;  %v2415_v50 = vpack.c.bf16 %v1406_v11, %v1405_v62  ;;  %v1377_v11 = vld [vmem:[%s4068_s2 + $0x50] sm:$0xff] }
 0x294   :  { %v1424_v14 = vld [vmem:[%s4068_s2 + $0x1c8] sm:$0xff]  ;;  %v1407_v16 = vld [vmem:[%s4068_s2 + $0x140] sm:$0xff] }
 0x295   :  { %2380 = vmatpush3.bf16.msra.mxu1 %v2379_v57  ;;  %v1393_v57 = vld [vmem:[%s4068_s2 + $0xd0] sm:$0xff]  ;;  %v2417_v0 = vpack.c.bf16 %v1424_v14, %v1423_v38  ;;  %v1408_v19 = vld [vmem:[%s4068_s2 + $0x148] sm:$0xff] }
 0x296   :  { %2382 = vmatprep.subr.bf16.mxu1 %v2381_v27  ;;  %2412 = vmatpush3.bf16.msra.mxu0 %v2411_v53  ;;  %v1394_v27 = vld [vmem:[%s4068_s2 + $0xd8] sm:$0xff]  ;;  %v2387_v53 = vpack.c.bf16 %v1376_v24, %v1375_v13  ;;  %v2419_v38 = vpack.c.bf16 %v1408_v19, %v1407_v16 }
 0x297   :  { %2414 = vmatprep.subr.bf16.mxu0 %v2413_v2  ;;  %v2389_v62 = vpack.c.bf16 %v1394_v27, %v1393_v57  ;;  %v1378_v2 = vld [vmem:[%s4068_s2 + $0x58] sm:$0xff]  ;;  %v839_v57 = vand.u32 65535, %v3125_v23  ;;  %v931_v27 = vand.u32 65535, %v3150_v40  ;;  %v669_v40 = vand.u32 65535, %v3164_v49 }
 0x298   :  { %v2391_v14 = vpack.c.bf16 %v1378_v2, %v1377_v11 }
 0x299   :  { %2384 = vmatpush3.bf16.msra.mxu1 %v2383_v15  ;;  %v655_v15 = vand.u32 65535, %v3128_v25  ;;  %v841_v19 = vcvt.s32.f32 %v839_v57 }
 0x29a   :  { %2386 = vmatprep.subr.bf16.mxu1 %v2385_v47  ;;  %2416 = vmatpush3.bf16.msra.mxu0 %v2415_v50  ;;  %v747_v47 = vand.u32 65535, %v3136_v33 }
 0x29b   :  { %2418 = vmatprep.subr.bf16.mxu0 %v2417_v0  ;;  %v657_v24 = vcvt.s32.f32 %v655_v15 }
 0x29c   :  { %v749_v25 = vcvt.s32.f32 %v747_v47 }
 0x29d   :  { %2388 = vmatpush3.bf16.msra.mxu1 %v2387_v53 }
 0x29e   :  { %2390 = vmatprep.subr.bf16.mxu1 %v2389_v62  ;;  %2420 = vmatpush3.bf16.msra.mxu0 %v2419_v38  ;;  %v933_v62 = vcvt.s32.f32 %v931_v27 }
 0x2a1   :  { %2392 = vmatpush3.bf16.msra.mxu1 %v2391_v14  ;;  %v671_v14 = vcvt.s32.f32 %v669_v40  ;;  %v1410_v40 = vld [vmem:[%s4068_s2 + $0x158] sm:$0xff] }
 0x2d8   :  { %v3512_v13 = vpop.xlane.xlu0 %659 }
 0x2d9   :  { %vm661_vm4 = vcmp.eq.f32.partialorder %v3132_v30, %v3512_v13  ;;  %v761_v30 = vand.u32 65535, %v3147_v39 }
 0x2da   :  { %v662_v50 = vsel %vm661_vm4, %v657_v24, inf }
 0x2db   :  { %663 = vmin.xlane.f32.xlu0 %v662_v50  ;;  %v763_v39 = vcvt.s32.f32 %v761_v30  ;;  %v1409_v30 = vld [vmem:[%s4068_s2 + $0x150] sm:$0xff] }
 0x2dc   :  { %v3518_v0 = vpop.xlane.xlu0 %843  ;;  %v3520_v16 = vpop.xlane.xlu1 %751 }
 0x2dd   :  { %vm845_vm5 = vcmp.eq.f32.partialorder %v3142_v36, %v3518_v0  ;;  %vm753_vm6 = vcmp.eq.f32.partialorder %v3144_v41, %v3520_v16  ;;  %v945_v36 = vand.u32 65535, %v3161_v48  ;;  %v853_v41 = vand.u32 65535, %v3179_v9 }
 0x2de   :  { %v846_v23 = vsel %vm845_vm5, %v841_v19, inf  ;;  %v754_v33 = vsel %vm753_vm6, %v749_v25, inf  ;;  %v775_v48 = vand.u32 65535, %v3176_v4  ;;  %v683_v9 = vand.u32 65535, %v3195_v61  ;;  %v1425_v4 = vld [vmem:[%s4068_s2 + $0x1d0] sm:$0xff]  ;;  %v1380_v19 = vld [vmem:[%s4068_s2 + $0x68] sm:$0xff] }
 0x2df   :  { %847 = vmin.xlane.f32.xlu0 %v846_v23  ;;  %755 = vmin.xlane.f32.xlu1 %v754_v33  ;;  %v855_v24 = vcvt.s32.f32 %v853_v41  ;;  %v947_v57 = vcvt.s32.f32 %v945_v36  ;;  %v959_v25 = vand.u32 65535, %v3192_v26 }
 0x2e0   :  { %v3528_v53 = vpop.xlane.xlu1 %935  ;;  %v685_v41 = vcvt.s32.f32 %v683_v9  ;;  %v777_v26 = vcvt.s32.f32 %v775_v48  ;;  %v1381_v9 = vld [vmem:[%s4068_s2 + $0x70] sm:$0xff] }
 0x2e1   :  { %vm937_vm7 = vcmp.eq.f32.partialorder %v3157_v45, %v3528_v53 }
 0x2e2   :  { %v938_v11 = vsel %vm937_vm7, %v933_v62, inf  ;;  %v867_v62 = vand.u32 65535, %v3211_v5  ;;  %v1397_v5 = vld [vmem:[%s4068_s2 + $0xf0] sm:$0xff] }
 0x2e3   :  { %939 = vmin.xlane.f32.xlu1 %v938_v11 }
 0x2e4   :  { %v3534_v2 = vpop.xlane.xlu0 %673  ;;  %v3536_v38 = vpop.xlane.xlu1 %765 }
 0x2e5   :  { %vm675_vm8 = vcmp.eq.f32.partialorder %v3170_v56, %v3534_v2  ;;  %vm767_vm9 = vcmp.eq.f32.partialorder %v3172_v59, %v3536_v38  ;;  %v1395_v56 = vld [vmem:[%s4068_s2 + $0xe0] sm:$0xff]  ;;  %v1396_v59 = vld [vmem:[%s4068_s2 + $0xe8] sm:$0xff] }
 0x2e6   :  { %v676_v49 = vsel %vm675_vm8, %v671_v14, inf  ;;  %v768_v45 = vsel %vm767_vm9, %v763_v39, inf  ;;  %v2393_v27 = vpack.c.bf16 %v1396_v59, %v1395_v56  ;;  %v2423_v14 = vpack.c.bf16 %v1410_v40, %v1409_v30  ;;  %v1398_v39 = vld [vmem:[%s4068_s2 + $0xf8] sm:$0xff]  ;;  %v1413_v40 = vld [vmem:[%s4068_s2 + $0x170] sm:$0xff] }
 0x2e7   :  { %677 = vmin.xlane.f32.xlu0 %v676_v49  ;;  %769 = vmin.xlane.f32.xlu1 %v768_v45  ;;  %v1427_v49 = vld [vmem:[%s4068_s2 + $0x1e0] sm:$0xff] }
 0x2e8   :  { %v3544_v15 = vpop.xlane.xlu0 %857  ;;  %v3546_v47 = vpop.xlane.xlu1 %949  ;;  %2394 = vmatprep.subr.bf16.mxu1 %v2393_v27  ;;  %v697_v27 = vand.u32 65535, %v3227_v8  ;;  %v1430_v8 = vld [vmem:[%s4068_s2 + $0x1f8] sm:$0xff] }
 0x2e9   :  { %vm859_vm10 = vcmp.eq.f32.partialorder %v3186_v17, %v3544_v15  ;;  %vm951_vm11 = vcmp.eq.f32.partialorder %v3188_v20, %v3546_v47  ;;  %v1426_v17 = vld [vmem:[%s4068_s2 + $0x1d8] sm:$0xff]  ;;  %v1379_v20 = vld [vmem:[%s4068_s2 + $0x60] sm:$0xff] }
 0x2ea   :  { %v860_v61 = vsel %vm859_vm10, %v855_v24, inf  ;;  %v952_v50 = vsel %vm951_vm11, %v947_v57, inf  ;;  %v2421_v23 = vpack.c.bf16 %v1426_v17, %v1425_v4  ;;  %v2395_v33 = vpack.c.bf16 %v1380_v19, %v1379_v20  ;;  %v1382_v24 = vld [vmem:[%s4068_s2 + $0x78] sm:$0xff]  ;;  %v1411_v4 = vld [vmem:[%s4068_s2 + $0x160] sm:$0xff] }
 0x2eb   :  { %861 = vmin.xlane.f32.xlu0 %v860_v61  ;;  %953 = vmin.xlane.f32.xlu1 %v952_v50  ;;  %v961_v57 = vcvt.s32.f32 %v959_v25  ;;  %v2399_v59 = vpack.c.bf16 %v1382_v24, %v1381_v9  ;;  %v1412_v61 = vld [vmem:[%s4068_s2 + $0x168] sm:$0xff]  ;;  %v789_v50 = vand.u32 65535, %v3208_v35  ;;  %v869_v19 = vcvt.s32.f32 %v867_v62  ;;  %v1429_v35 = vld [vmem:[%s4068_s2 + $0x1f0] sm:$0xff]  ;;  %v1414_v62 = vld [vmem:[%s4068_s2 + $0x178] sm:$0xff] }
 0x2ec   :  { %v3578_v11 = vpop.xlane.xlu0 %687  ;;  %v3580_v36 = vpop.xlane.xlu1 %779  ;;  %2422 = vmatprep.subr.bf16.mxu0 %v2421_v23  ;;  %2396 = vmatpush3.bf16.msra.mxu1 %v2395_v33  ;;  %v2427_v25 = vpack.c.bf16 %v1412_v61, %v1411_v4  ;;  %v1447_v23 = vld [vmem:[%s4068_s2 + $0x280] sm:$0xff]  ;;  %v1023_v24 = vand.u32 65535, %v3255_v22  ;;  %v1207_v22 = vand.u32 65535, %v3271_v32  ;;  %v1037_v32 = vand.u32 65535, %v3287_v44 }
 0x2ed   :  { %vm689_vm12 = vcmp.eq.f32.partialorder %v3202_v31, %v3578_v11  ;;  %vm781_vm13 = vcmp.eq.f32.partialorder %v3204_v46, %v3580_v36  ;;  %2424 = vmatpush3.bf16.msra.mxu0 %v2423_v14  ;;  %v2397_v31 = vpack.c.bf16 %v1398_v39, %v1397_v5  ;;  %v1428_v46 = vld [vmem:[%s4068_s2 + $0x1e8] sm:$0xff]  ;;  %v973_v14 = vand.u32 65535, %v3224_v52  ;;  %v1479_v52 = vld [vmem:[%s4068_s2 + $0x380] sm:$0xff] }
 0x2ee   :  { %v690_v45 = vsel %vm689_vm12, %v685_v41, inf  ;;  %v782_v48 = vsel %vm781_vm13, %v777_v26, inf  ;;  %v2425_v56 = vpack.c.bf16 %v1428_v46, %v1427_v49  ;;  %v2431_v26 = vpack.c.bf16 %v1414_v62, %v1413_v40  ;;  %v1480_v46 = vld [vmem:[%s4068_s2 + $0x388] sm:$0xff] }
 0x2ef   :  { %691 = vmin.xlane.f32.xlu0 %v690_v45  ;;  %783 = vmin.xlane.f32.xlu1 %v782_v48  ;;  %v881_v5 = vand.u32 65535, %v3239_v12  ;;  %v699_v45 = vcvt.s32.f32 %v697_v27  ;;  %v791_v48 = vcvt.s32.f32 %v789_v50  ;;  %v2465_v9 = vpack.c.bf16 %v1480_v46, %v1479_v52 }
 0x2f0   :  { %v3612_v17 = vpop.xlane.xlu0 %871  ;;  %v3614_v20 = vpop.xlane.xlu1 %963  ;;  %2398 = vmatprep.subr.bf16.mxu1 %v2397_v31  ;;  %2426 = vmatprep.subr.bf16.mxu0 %v2425_v56  ;;  %v1221_v44 = vand.u32 65535, %v3303_v55  ;;  %v1051_v55 = vand.u32 65535, %v3319_v63  ;;  %v1235_v63 = vand.u32 65535, %v3335_v6 }
 0x2f1   :  { %vm873_vm14 = vcmp.eq.f32.partialorder %v3218_v51, %v3612_v17  ;;  %vm965_vm15 = vcmp.eq.f32.partialorder %v3220_v42, %v3614_v20  ;;  %2400 = vmatpush3.bf16.msra.mxu1 %v2399_v59  ;;  %2428 = vmatpush3.bf16.msra.mxu0 %v2427_v25  ;;  %v2429_v51 = vpack.c.bf16 %v1430_v8, %v1429_v35  ;;  %v1448_v42 = vld [vmem:[%s4068_s2 + $0x288] sm:$0xff]  ;;  %v883_v56 = vcvt.s32.f32 %v881_v5 }
 0x2f2   :  { %v874_v33 = vsel %vm873_vm14, %v869_v19, inf  ;;  %v966_v30 = vsel %vm965_vm15, %v961_v57, inf  ;;  %v2433_v41 = vpack.c.bf16 %v1448_v42, %v1447_v23  ;;  %v975_v59 = vcvt.s32.f32 %v973_v14 }
 0x2f3   :  { %875 = vmin.xlane.f32.xlu0 %v874_v33  ;;  %967 = vmin.xlane.f32.xlu1 %v966_v30  ;;  %v1025_v19 = vcvt.s32.f32 %v1023_v24  ;;  %v1209_v23 = vcvt.s32.f32 %v1207_v22  ;;  %v1039_v42 = vcvt.s32.f32 %v1037_v32  ;;  %v1223_v5 = vcvt.s32.f32 %v1221_v44  ;;  %v4120_v22 = vld [vmem:[#allocation16_spill] sm:$0xff]  ;;  %v4122_v32 = vld [vmem:[#allocation15_spill] sm:$0xff] }
 0x2f4   :  { %v3640_v39 = vpop.xlane.xlu0 %701  ;;  %v3642_v49 = vpop.xlane.xlu1 %793  ;;  %2430 = vmatprep.subr.bf16.mxu0 %v2429_v51  ;;  %2434 = vmatprep.subr.bf16.mxu1 %v2433_v41  ;;  %v4114_v41 = vld [vmem:[#allocation8_spill] sm:$0xff]  ;;  %v1065_v6 = vand.u32 65535, %v4120_v22 }
 0x2f5   :  { %vm703_vm0 = vcmp.eq.f32.partialorder %v3233_v1, %v3640_v39  ;;  %vm795_vm1 = vcmp.eq.f32.partialorder %v3235_v58, %v3642_v49  ;;  %2432 = vmatpush3.bf16.msra.mxu0 %v2431_v26  ;;  %v1115_v1 = vand.u32 65535, %v3243_v21  ;;  %v1299_v21 = vand.u32 65535, %v3259_v43  ;;  %v4124_v44 = vld [vmem:[#allocation20_spill] sm:$0xff] }
 0x2f6   :  { %v704_v31 = vsel %vm703_vm0, %v699_v45, inf  ;;  %v796_v12 = vsel %vm795_vm1, %v791_v48, inf  ;;  %2466 = vmatprep.subr.bf16.mxu0 %v2465_v9  ;;  %v1129_v43 = vand.u32 65535, %v3275_v18  ;;  %v1313_v18 = vand.u32 65535, %v3291_v54 }
 0x2f7   :  { %705 = vmin.xlane.f32.xlu0 %v704_v31  ;;  %797 = vmin.xlane.f32.xlu1 %v796_v12  ;;  %v1117_v25 = vcvt.s32.f32 %v1115_v1  ;;  %v1301_v33 = vcvt.s32.f32 %v1299_v21  ;;  %v1143_v54 = vand.u32 65535, %v4114_v41  ;;  %v4116_v31 = vld [vmem:[#allocation10_spill] sm:$0xff]  ;;  %v1053_v1 = vcvt.s32.f32 %v1051_v55  ;;  %v4126_v41 = vld [vmem:[#allocation19_spill] sm:$0xff] }
 0x2f8   :  { %v3656_v58 = vpop.xlane.xlu0 %885  ;;  %v3658_v57 = vpop.xlane.xlu1 %977  ;;  %v1131_v40 = vcvt.s32.f32 %v1129_v43  ;;  %v1315_v45 = vcvt.s32.f32 %v1313_v18  ;;  %v1327_v12 = vand.u32 65535, %v4116_v31  ;;  %v4121_v43 = vld [vmem:[#allocation14_spill] sm:$0xff] }
 0x2f9   :  { %vm887_vm2 = vcmp.eq.f32.partialorder %v3249_v29, %v3656_v58  ;;  %vm979_vm3 = vcmp.eq.f32.partialorder %v3251_v34, %v3658_v57  ;;  %v1145_v24 = vcvt.s32.f32 %v1143_v54  ;;  %v4128_v31 = vld [vmem:[#allocation22_spill] sm:$0xff] }
 0x2fa   :  { %v888_v4 = vsel %vm887_vm2, %v883_v56, inf  ;;  %v980_v61 = vsel %vm979_vm3, %v975_v59, inf  ;;  %v4117_v56 = vld [vmem:[#allocation11_spill] sm:$0xff] }
 0x2fb   :  { %889 = vmin.xlane.f32.xlu0 %v888_v4  ;;  %981 = vmin.xlane.f32.xlu1 %v980_v61  ;;  %v4119_v61 = vld [vmem:[#allocation13_spill] sm:$0xff] }
 0x2fc   :  { %v3666_v50 = vpop.xlane.xlu0 %1027  ;;  %v3668_v27 = vpop.xlane.xlu1 %1119  ;;  %v1157_v21 = vand.u32 65535, %v4119_v61 }
 0x2fd   :  { %vm1029_vm4 = vcmp.eq.f32.partialorder %v3265_v60, %v3666_v50  ;;  %vm1121_vm5 = vcmp.eq.f32.partialorder %v3267_v10, %v3668_v27 }
 0x2fe   :  { %v1030_v29 = vsel %vm1029_vm4, %v1025_v19, inf  ;;  %v1122_v34 = vsel %vm1121_vm5, %v1117_v25, inf }
 0x2ff   :  { %1031 = vmin.xlane.f32.xlu0 %v1030_v29  ;;  %1123 = vmin.xlane.f32.xlu1 %v1122_v34  ;;  %v1237_v29 = vcvt.s32.f32 %v1235_v63  ;;  %v1329_v34 = vcvt.s32.f32 %v1327_v12 }
 0x300   :  { %v3676_v35 = vpop.xlane.xlu0 %1211  ;;  %v3678_v8 = vpop.xlane.xlu1 %1303 }
 0x301   :  { %vm1213_vm6 = vcmp.eq.f32.partialorder %v3281_v7, %v3676_v35  ;;  %vm1305_vm7 = vcmp.eq.f32.partialorder %v3283_v28, %v3678_v8  ;;  %v4113_v7 = vld [vmem:[#allocation7_spill] sm:$0xff] }
 0x302   :  { %v1214_v60 = vsel %vm1213_vm6, %v1209_v23, inf  ;;  %v1306_v10 = vsel %vm1305_vm7, %v1301_v33, inf }
 0x303   :  { %1215 = vmin.xlane.f32.xlu0 %v1214_v60  ;;  %1307 = vmin.xlane.f32.xlu1 %v1306_v10  ;;  %v1067_v60 = vcvt.s32.f32 %v1065_v6  ;;  %v4123_v10 = vld [vmem:[#allocation17_spill] sm:$0xff]  ;;  %v942_v6 = vcvt.f32.s32 %v3528_v53  ;;  %v680_v53 = vcvt.f32.s32 %v3534_v2 }
 0x304   :  { %v3686_v30 = vpop.xlane.xlu0 %1041  ;;  %v3688_v51 = vpop.xlane.xlu1 %1133  ;;  %v1341_v18 = vand.u32 65535, %v4123_v10 }
 0x305   :  { %vm1043_vm8 = vcmp.eq.f32.partialorder %v3297_v3, %v3686_v30  ;;  %vm1135_vm9 = vcmp.eq.f32.partialorder %v4113_v7, %v3688_v51  ;;  %v4115_v3 = vld [vmem:[#allocation9_spill] sm:$0xff] }
 0x306   :  { %v1044_v28 = vsel %vm1043_vm8, %v1039_v42, inf  ;;  %v1136_v62 = vsel %vm1135_vm9, %v1131_v40, inf  ;;  %v1249_v42 = vand.u32 65535, %v4124_v44  ;;  %v1433_v44 = vld [vmem:[%s4068_s2 + $0x210] sm:$0xff] }
 0x307   :  { %1045 = vmin.xlane.f32.xlu0 %v1044_v28  ;;  %1137 = vmin.xlane.f32.xlu1 %v1136_v62  ;;  %v1159_v28 = vcvt.s32.f32 %v1157_v21  ;;  %v4125_v62 = vld [vmem:[#allocation18_spill] sm:$0xff] }
 0x308   :  { %v3696_v26 = vpop.xlane.xlu0 %1225  ;;  %v3698_v14 = vpop.xlane.xlu1 %1317 }
 0x309   :  { %vm1227_vm10 = vcmp.eq.f32.partialorder %v3313_v37, %v3696_v26  ;;  %vm1319_vm11 = vcmp.eq.f32.partialorder %v4115_v3, %v3698_v14  ;;  %v4118_v37 = vld [vmem:[#allocation12_spill] sm:$0xff] }
 0x30a   :  { %v1228_v48 = vsel %vm1227_vm10, %v1223_v5, inf  ;;  %v1320_v52 = vsel %vm1319_vm11, %v1315_v45, inf  ;;  %v1251_v5 = vcvt.s32.f32 %v1249_v42  ;;  %v1434_v42 = vld [vmem:[%s4068_s2 + $0x218] sm:$0xff] }
 0x30b   :  { %1229 = vmin.xlane.f32.xlu0 %v1228_v48  ;;  %1321 = vmin.xlane.f32.xlu1 %v1320_v52  ;;  %v1343_v48 = vcvt.s32.f32 %v1341_v18  ;;  %v4127_v52 = vld [vmem:[#allocation21_spill] sm:$0xff] }
 0x30c   :  { %v3706_v46 = vpop.xlane.xlu0 %1055  ;;  %v3708_v9 = vpop.xlane.xlu1 %1147 }
 0x30d   :  { %vm1057_vm12 = vcmp.eq.f32.partialorder %v4117_v56, %v3706_v46  ;;  %vm1149_vm13 = vcmp.eq.f32.partialorder %v4118_v37, %v3708_v9  ;;  %v758_v56 = vcvt.f32.s32 %v3520_v16 }
 0x30e   :  { %v1058_v59 = vsel %vm1057_vm12, %v1053_v1, inf  ;;  %v1150_v4 = vsel %vm1149_vm13, %v1145_v24, inf  ;;  %v666_v1 = vcvt.f32.s32 %v3512_v13  ;;  %v1432_v13 = vld [vmem:[%s4068_s2 + $0x208] sm:$0xff] }
 0x30f   :  { %1059 = vmin.xlane.f32.xlu0 %v1058_v59  ;;  %1151 = vmin.xlane.f32.xlu1 %v1150_v4  ;;  %v850_v4 = vcvt.f32.s32 %v3518_v0  ;;  %v759_v22 = vshll.u32 %v758_v56, 16  ;;  %v1449_v0 = vld [vmem:[%s4068_s2 + $0x290] sm:$0xff] }
 0x310   :  { %v3716_v19 = vpop.xlane.xlu0 %1239  ;;  %v3718_v25 = vpop.xlane.xlu1 %1331  ;;  %v667_v59 = vshll.u32 %v666_v1, 16  ;;  %v681_v1 = vshll.u32 %v680_v53, 16  ;;  %v1484_v53 = vld [vmem:[%s4068_s2 + $0x3a8] sm:$0xff] }
 0x311   :  { %vm1241_vm14 = vcmp.eq.f32.partialorder %v4121_v43, %v3716_v19  ;;  %vm1333_vm15 = vcmp.eq.f32.partialorder %v4122_v32, %v3718_v25  ;;  %v1450_v32 = vld [vmem:[%s4068_s2 + $0x298] sm:$0xff] }
 0x312   :  { %v1242_v23 = vsel %vm1241_vm14, %v1237_v29, inf  ;;  %v1334_v33 = vsel %vm1333_vm15, %v1329_v34, inf  ;;  %v1431_v34 = vld [vmem:[%s4068_s2 + $0x200] sm:$0xff] }
 0x313   :  { %1243 = vmin.xlane.f32.xlu0 %v1242_v23  ;;  %1335 = vmin.xlane.f32.xlu1 %v1334_v33  ;;  %v772_v23 = vcvt.f32.s32 %v3536_v38  ;;  %v2435_v18 = vpack.c.bf16 %v1432_v13, %v1431_v34  ;;  %v2437_v38 = vpack.c.bf16 %v1450_v32, %v1449_v0  ;;  %v1466_v34 = vld [vmem:[%s4068_s2 + $0x318] sm:$0xff]  ;;  %v3807_v13 = vld [vmem:[%s4068_s2 + $0x2b0] sm:$0xff]  ;;  %v1483_v32 = vld [vmem:[%s4068_s2 + $0x3a0] sm:$0xff] }
 0x314   :  { %v3726_v40 = vpop.xlane.xlu0 %1069  ;;  %v3728_v7 = vpop.xlane.xlu1 %1161  ;;  %v1454_v0 = vld [vmem:[%s4068_s2 + $0x2b8] sm:$0xff] }
 0x315   :  { %vm1071_vm0 = vcmp.eq.f32.partialorder %v4125_v62, %v3726_v40  ;;  %vm1163_vm1 = vcmp.eq.f32.partialorder %v4126_v41, %v3728_v7  ;;  %v943_v62 = vshll.u32 %v942_v6, 16  ;;  %v4129_v41 = vld [vmem:[#allocation6_spill] sm:$0xff] }
 0x316   :  { %v1072_v54 = vsel %vm1071_vm0, %v1067_v60, inf  ;;  %v1164_v55 = vsel %vm1163_vm1, %v1159_v28, inf  ;;  %v851_v60 = vshll.u32 %v850_v4, 16  ;;  %v1463_v28 = vld [vmem:[%s4068_s2 + $0x300] sm:$0xff] }
 0x317   :  { %1073 = vmin.xlane.f32.xlu0 %v1072_v54  ;;  %1165 = vmin.xlane.f32.xlu1 %v1164_v55  ;;  %v1464_v54 = vld [vmem:[%s4068_s2 + $0x308] sm:$0xff]  ;;  %v1451_v55 = vld [vmem:[%s4068_s2 + $0x2a0] sm:$0xff] }
 0x318   :  { %v3734_v45 = vpop.xlane.xlu0 %1253  ;;  %v3736_v3 = vpop.xlane.xlu1 %1345 }
 0x319   :  { %vm1255_vm2 = vcmp.eq.f32.partialorder %v4127_v52, %v3734_v45  ;;  %vm1347_vm3 = vcmp.eq.f32.partialorder %v4128_v31, %v3736_v3  ;;  %v2519_v31 = vmov 1.0  }
 0x31a   :  { %v1256_v12 = vsel %vm1255_vm2, %v1251_v5, inf  ;;  %v1348_v63 = vsel %vm1347_vm3, %v1343_v48, inf  ;;  %v1452_v5 = vld [vmem:[%s4068_s2 + $0x2a8] sm:$0xff]  ;;  %v864_v48 = vcvt.f32.s32 %v3544_v15  ;;  %v3792_v15 = vld [vmem:[%s4068_s2 + $0x220] sm:$0xff] }
 0x31b   :  { %1257 = vmin.xlane.f32.xlu0 %v1256_v12  ;;  %1349 = vmin.xlane.f32.xlu1 %v1348_v63  ;;  %v1481_v12 = vld [vmem:[%s4068_s2 + $0x390] sm:$0xff]  ;;  %v1482_v63 = vld [vmem:[%s4068_s2 + $0x398] sm:$0xff]  ;;  %v2441_v6 = vpack.c.bf16 %v1452_v5, %v1451_v55  ;;  %v1467_v55 = vld [vmem:[%s4068_s2 + $0x320] sm:$0xff] }
 0x31c   :  { %v1468_v5 = vld [vmem:[%s4068_s2 + $0x328] sm:$0xff] }
 0x368   :  { %v664_v24 = vpop.xlane.xlu0 %663 }
 0x369   :  { %v665_v37 = vcvt.f32.s32 %v664_v24  ;;  %v773_v24 = vshll.u32 %v772_v23, 16  ;;  %v865_v23 = vshll.u32 %v864_v48, 16  ;;  %v3845_v48 = vld [vmem:[%s4068_s2 + $0x2c0] sm:$0xff] }
 0x36b   :  { %v668_v43 = vadd.s32 %v667_v59, %v665_v37  ;;  %v1436_v37 = vld [vmem:[%s4068_s2 + $0x228] sm:$0xff]  ;;  %v956_v59 = vcvt.f32.s32 %v3546_v47 }
 0x36c   :  { %v848_v61 = vpop.xlane.xlu0 %847  ;;  %v756_v21 = vpop.xlane.xlu1 %755 }
 0x36d   :  { %v757_v29 = vcvt.f32.s32 %v756_v21  ;;  %v849_v16 = vcvt.f32.s32 %v848_v61  ;;  %vm711_vm5 = vcmp.eq.s32.totalorder %v4129_v41, %v668_v43  ;;  %v2439_v21 = vpack.c.bf16 %v1434_v42, %v1433_v44  ;;  %v3828_v42 = vld [vmem:[%s4068_s2 + $0x230] sm:$0xff] }
 0x36e   :  { %v2443_v44 = vpack.c.bf16 %v1436_v37, %v3792_v15  ;;  %v878_v15 = vcvt.f32.s32 %v3612_v17  ;;  %v970_v17 = vcvt.f32.s32 %v3614_v20  ;;  %v3884_v20 = vld [vmem:[%s4068_s2 + $0x2d0] sm:$0xff] }
 0x36f   :  { %v760_v33 = vadd.s32 %v759_v22, %v757_v29  ;;  %v852_v52 = vadd.s32 %v851_v60, %v849_v16  ;;  %v2467_v22 = vpack.c.bf16 %v1464_v54, %v1463_v28  ;;  %v1465_v29 = vld [vmem:[%s4068_s2 + $0x310] sm:$0xff]  ;;  %v2469_v16 = vpack.c.bf16 %v1482_v63, %v1481_v12  ;;  %v1456_v63 = vld [vmem:[%s4068_s2 + $0x2c8] sm:$0xff] }
 0x370   :  { %v940_v10 = vpop.xlane.xlu1 %939  ;;  %v786_v60 = vcvt.f32.s32 %v3580_v36  ;;  %v957_v28 = vshll.u32 %v956_v59, 16  ;;  %v2473_v54 = vpack.c.bf16 %v1484_v53, %v1483_v32  ;;  %v1458_v53 = vld [vmem:[%s4068_s2 + $0x2d8] sm:$0xff] }
 0x371   :  { %v941_v2 = vcvt.f32.s32 %v940_v10  ;;  %vm803_vm4 = vcmp.eq.s32.totalorder %v4129_v41, %v760_v33  ;;  %v694_v33 = vcvt.f32.s32 %v3578_v11  ;;  %vm895_vm7 = vcmp.eq.s32.totalorder %v4129_v41, %v852_v52  ;;  %v3833_v11 = vld [vmem:[%s4068_s2 + $0x238] sm:$0xff] }
 0x372   :  { %1992 = vmatprep.mubr.msk.f32.mxu1 %vm803_vm4, %v2519_v31  ;;  %v787_v37 = vshll.u32 %v786_v60, 16  ;;  %v879_v60 = vshll.u32 %v878_v15, 16  ;;  %v892_v15 = vcvt.f32.s32 %v3656_v58 }
 0x373   :  { %v944_v56 = vadd.s32 %v943_v62, %v941_v2  ;;  %1993 = vmatmul.mubr.msk.f32.vlgmr.msra.gmra.mrb[16].mxu1 %vm711_vm5, %v2519_v31  ;;  %v2471_v2 = vpack.c.bf16 %v1466_v34, %v1465_v29  ;;  %v2475_v34 = vpack.c.bf16 %v1468_v5, %v1467_v55  ;;  %v1471_v55 = vld [vmem:[%s4068_s2 + $0x340] sm:$0xff]  ;;  %v1472_v5 = vld [vmem:[%s4068_s2 + $0x348] sm:$0xff] }
 0x374   :  { %v678_v4 = vpop.xlane.xlu0 %677  ;;  %2436 = vmatpush3.bf16.msra.mxu1 %v2435_v18  ;;  %v770_v61 = vpop.xlane.xlu1 %769 }
 0x375   :  { %v679_v47 = vcvt.f32.s32 %v678_v4  ;;  %v771_v43 = vcvt.f32.s32 %v770_v61  ;;  %vm987_vm6 = vcmp.eq.s32.totalorder %v4129_v41, %v944_v56  ;;  %2438 = vmatprep.subr.bf16.mxu1 %v2437_v38  ;;  %v2445_v38 = vpack.c.bf16 %v1454_v0, %v3807_v13 }
 0x376   :  { %2000 = vmatprep.mubr.msk.f32.mxu0 %vm987_vm6, %v2519_v31  ;;  %v695_v56 = vshll.u32 %v694_v33, 16  ;;  %v2447_v61 = vpack.c.bf16 %v3833_v11, %v3828_v42  ;;  %v2449_v13 = vpack.c.bf16 %v1456_v63, %v3845_v48  ;;  %v1488_v33 = vld [vmem:[%s4068_s2 + $0x3c8] sm:$0xff]  ;;  %v3919_v48 = vld [vmem:[%s4068_s2 + $0x2e0] sm:$0xff] }
 0x377   :  { %v682_v10 = vadd.s32 %v681_v1, %v679_v47  ;;  %v774_v18 = vadd.s32 %v773_v24, %v771_v43  ;;  %2001 = vmatmul.mubr.msk.f32.vlgmr.msra.gmra.mrb[20].mxu0 %vm895_vm7, %v2519_v31  ;;  %v1485_v1 = vld [vmem:[%s4068_s2 + $0x3b0] sm:$0xff]  ;;  %v1486_v24 = vld [vmem:[%s4068_s2 + $0x3b8] sm:$0xff]  ;;  %v1460_v63 = vld [vmem:[%s4068_s2 + $0x2e8] sm:$0xff] }
 0x378   :  { %v862_v62 = vpop.xlane.xlu0 %861  ;;  %2440 = vmatpush3.bf16.msra.mxu1 %v2439_v21  ;;  %2468 = vmatpush3.bf16.msra.mxu0 %v2467_v22  ;;  %v954_v36 = vpop.xlane.xlu1 %953  ;;  %v3866_v21 = vld [vmem:[%s4068_s2 + $0x240] sm:$0xff]  ;;  %v3871_v22 = vld [vmem:[%s4068_s2 + $0x248] sm:$0xff]  ;;  %v2477_v47 = vpack.c.bf16 %v1486_v24, %v1485_v1  ;;  %v1469_v43 = vld [vmem:[%s4068_s2 + $0x330] sm:$0xff] }
 0x379   :  { %v863_v52 = vcvt.f32.s32 %v862_v62  ;;  %v955_v12 = vcvt.f32.s32 %v954_v36  ;;  %vm804_vm8 = vcmp.eq.s32.totalorder %v4129_v41, %v774_v18  ;;  %vm712_vm9 = vcmp.eq.s32.totalorder %v4129_v41, %v682_v10  ;;  %2442 = vmatprep.subr.bf16.mxu1 %v2441_v6  ;;  %2470 = vmatprep.subr.bf16.mxu0 %v2469_v16  ;;  %v1470_v16 = vld [vmem:[%s4068_s2 + $0x338] sm:$0xff]  ;;  %v1489_v1 = vld [vmem:[%s4068_s2 + $0x3d0] sm:$0xff] }
 0x37a   :  { %1994 = vmatprep.mubr.msk.f32.mxu1 %vm804_vm8, %v2519_v31  ;;  %v708_v10 = vcvt.f32.s32 %v3640_v39  ;;  %v800_v18 = vcvt.f32.s32 %v3642_v49  ;;  %v2451_v11 = vpack.c.bf16 %v3871_v22, %v3866_v21  ;;  %v1442_v62 = vld [vmem:[%s4068_s2 + $0x258] sm:$0xff]  ;;  %v971_v39 = vshll.u32 %v970_v17, 16  ;;  %v1443_v21 = vld [vmem:[%s4068_s2 + $0x260] sm:$0xff]  ;;  %v1444_v22 = vld [vmem:[%s4068_s2 + $0x268] sm:$0xff] }
 0x37b   :  { %v866_v59 = vadd.s32 %v865_v23, %v863_v52  ;;  %v958_v4 = vadd.s32 %v957_v28, %v955_v12  ;;  %1995 = vmatmul.mubr.msk.f32.gmra.mrb[18].mxu1 %vm712_vm9, %v2519_v31  ;;  %v1487_v23 = vld [vmem:[%s4068_s2 + $0x3c0] sm:$0xff]  ;;  %v1441_v28 = vld [vmem:[%s4068_s2 + $0x250] sm:$0xff]  ;;  %v1490_v24 = vld [vmem:[%s4068_s2 + $0x3d8] sm:$0xff]  ;;  %v984_v17 = vcvt.f32.s32 %v3658_v57 }
 0x37c   :  { %v692_v6 = vpop.xlane.xlu0 %691  ;;  %2444 = vmatpush3.bf16.msra.mxu1 %v2443_v44  ;;  %2472 = vmatpush3.bf16.msra.mxu0 %v2471_v2  ;;  %v784_v29 = vpop.xlane.xlu1 %783  ;;  %v2479_v2 = vpack.c.bf16 %v1470_v16, %v1469_v43  ;;  %v1474_v43 = vld [vmem:[%s4068_s2 + $0x358] sm:$0xff]  ;;  %v1461_v57 = vld [vmem:[%s4068_s2 + $0x2f0] sm:$0xff] }
 0x37d   :  { %v693_v0 = vcvt.f32.s32 %v692_v6  ;;  %v785_v32 = vcvt.f32.s32 %v784_v29  ;;  %vm988_vm10 = vcmp.eq.s32.totalorder %v4129_v41, %v958_v4  ;;  %vm896_vm11 = vcmp.eq.s32.totalorder %v4129_v41, %v866_v59  ;;  %2446 = vmatprep.subr.bf16.mxu1 %v2445_v38  ;;  %2474 = vmatprep.subr.bf16.mxu0 %v2473_v54 }
 0x37e   :  { %2002 = vmatprep.mubr.msk.f32.mxu0 %vm988_vm10, %v2519_v31  ;;  %v2453_v38 = vpack.c.bf16 %v1458_v53, %v3884_v20  ;;  %v2481_v54 = vpack.c.bf16 %v1488_v33, %v1487_v23  ;;  %v2483_v29 = vpack.c.bf16 %v1472_v5, %v1471_v55  ;;  %v1492_v53 = vld [vmem:[%s4068_s2 + $0x3e8] sm:$0xff]  ;;  %v893_v23 = vshll.u32 %v892_v15, 16  ;;  %v1493_v55 = vld [vmem:[%s4068_s2 + $0x3f0] sm:$0xff]  ;;  %v1494_v5 = vld [vmem:[%s4068_s2 + $0x3f8] sm:$0xff] }
 0x37f   :  { %v696_v44 = vadd.s32 %v695_v56, %v693_v0  ;;  %v788_v42 = vadd.s32 %v787_v37, %v785_v32  ;;  %2003 = vmatmul.mubr.msk.f32.gmra.mrb[22].mxu0 %vm896_vm11, %v2519_v31  ;;  %v709_v56 = vshll.u32 %v708_v10, 16  ;;  %v801_v37 = vshll.u32 %v800_v18, 16  ;;  %v1462_v0 = vld [vmem:[%s4068_s2 + $0x2f8] sm:$0xff]  ;;  %v1491_v32 = vld [vmem:[%s4068_s2 + $0x3e0] sm:$0xff] }
 0x380   :  { %v876_v36 = vpop.xlane.xlu0 %875  ;;  %2448 = vmatpush3.bf16.msra.mxu1 %v2447_v61  ;;  %2476 = vmatpush3.bf16.msra.mxu0 %v2475_v34  ;;  %v968_v49 = vpop.xlane.xlu1 %967  ;;  %v2455_v61 = vpack.c.bf16 %v1442_v62, %v1441_v28  ;;  %v2457_v34 = vpack.c.bf16 %v1460_v63, %v3919_v48  ;;  %v1034_v33 = vcvt.f32.s32 %v3666_v50  ;;  %v1445_v50 = vld [vmem:[%s4068_s2 + $0x270] sm:$0xff] }
 0x381   :  { %v877_v52 = vcvt.f32.s32 %v876_v36  ;;  %v969_v12 = vcvt.f32.s32 %v968_v49  ;;  %vm805_vm12 = vcmp.eq.s32.totalorder %v4129_v41, %v788_v42  ;;  %vm713_vm13 = vcmp.eq.s32.totalorder %v4129_v41, %v696_v44  ;;  %2450 = vmatprep.subr.bf16.mxu1 %v2449_v13  ;;  %2478 = vmatprep.subr.bf16.mxu0 %v2477_v47  ;;  %v1473_v47 = vld [vmem:[%s4068_s2 + $0x350] sm:$0xff]  ;;  %v1475_v49 = vld [vmem:[%s4068_s2 + $0x360] sm:$0xff] }
 0x382   :  { %1996 = vmatprep.mubr.msk.f32.mxu1 %vm805_vm12, %v2519_v31  ;;  %v2485_v13 = vpack.c.bf16 %v1490_v24, %v1489_v1  ;;  %v2459_v44 = vpack.c.bf16 %v1444_v22, %v1443_v21  ;;  %v985_v42 = vshll.u32 %v984_v17, 16  ;;  %v2487_v62 = vpack.c.bf16 %v1474_v43, %v1473_v47 }
 0x383   :  { %v880_v59 = vadd.s32 %v879_v60, %v877_v52  ;;  %v972_v4 = vadd.s32 %v971_v39, %v969_v12  ;;  %1997 = vmatmul.mubr.msk.f32.gmra.mrb[20].mxu1 %vm713_vm13, %v2519_v31  ;;  %v1126_v60 = vcvt.f32.s32 %v3668_v27  ;;  %v2461_v39 = vpack.c.bf16 %v1462_v0, %v1461_v57  ;;  %v1446_v27 = vld [vmem:[%s4068_s2 + $0x278] sm:$0xff] }
 0x384   :  { %v706_v6 = vpop.xlane.xlu0 %705  ;;  %2452 = vmatpush3.bf16.msra.mxu1 %v2451_v11  ;;  %2480 = vmatpush3.bf16.msra.mxu0 %v2479_v2  ;;  %v798_v58 = vpop.xlane.xlu1 %797  ;;  %v2489_v36 = vpack.c.bf16 %v1492_v53, %v1491_v32  ;;  %v1035_v48 = vshll.u32 %v1034_v33, 16  ;;  %v1218_v12 = vcvt.f32.s32 %v3676_v35  ;;  %v1310_v24 = vcvt.f32.s32 %v3678_v8  ;;  %v1477_v35 = vld [vmem:[%s4068_s2 + $0x370] sm:$0xff]  ;;  %v1478_v8 = vld [vmem:[%s4068_s2 + $0x378] sm:$0xff] }
 0x385   :  { %v707_v16 = vcvt.f32.s32 %v706_v6  ;;  %v799_v20 = vcvt.f32.s32 %v798_v58  ;;  %vm989_vm14 = vcmp.eq.s32.totalorder %v4129_v41, %v972_v4  ;;  %vm897_vm15 = vcmp.eq.s32.totalorder %v4129_v41, %v880_v59  ;;  %2454 = vmatprep.subr.bf16.mxu1 %v2453_v38  ;;  %2482 = vmatprep.subr.bf16.mxu0 %v2481_v54  ;;  %v1476_v54 = vld [vmem:[%s4068_s2 + $0x368] sm:$0xff] }
 0x386   :  { %2004 = vmatprep.mubr.msk.f32.mxu0 %vm989_vm14, %v2519_v31  ;;  %v1127_v52 = vshll.u32 %v1126_v60, 16  ;;  %v2491_v59 = vpack.c.bf16 %v1476_v54, %v1475_v49  ;;  %v2493_v4 = vpack.c.bf16 %v1494_v5, %v1493_v55  ;;  %v1219_v22 = vshll.u32 %v1218_v12, 16 }
 0x387   :  { %v710_v10 = vadd.s32 %v709_v56, %v707_v16  ;;  %v802_v18 = vadd.s32 %v801_v37, %v799_v20  ;;  %2005 = vmatmul.mubr.msk.f32.gmra.mrb[24].mxu0 %vm897_vm15, %v2519_v31  ;;  %v2463_v37 = vpack.c.bf16 %v1446_v27, %v1445_v50  ;;  %v1311_v58 = vshll.u32 %v1310_v24, 16 }
 0x388   :  { %v890_v11 = vpop.xlane.xlu0 %889  ;;  %2456 = vmatpush3.bf16.msra.mxu1 %v2455_v61  ;;  %2484 = vmatpush3.bf16.msra.mxu0 %v2483_v29  ;;  %v982_v28 = vpop.xlane.xlu1 %981  ;;  %v1048_v29 = vcvt.f32.s32 %v3686_v30  ;;  %v2495_v43 = vpack.c.bf16 %v1478_v8, %v1477_v35  ;;  %v1232_v32 = vcvt.f32.s32 %v3696_v26  ;;  %v1324_v53 = vcvt.f32.s32 %v3698_v14 }
 0x389   :  { %v891_v2 = vcvt.f32.s32 %v890_v11  ;;  %v983_v38 = vcvt.f32.s32 %v982_v28  ;;  %vm806_vm0 = vcmp.eq.s32.totalorder %v4129_v41, %v802_v18  ;;  %vm714_vm1 = vcmp.eq.s32.totalorder %v4129_v41, %v710_v10  ;;  %2458 = vmatprep.subr.bf16.mxu1 %v2457_v34  ;;  %2486 = vmatprep.subr.bf16.mxu0 %v2485_v13 }
 0x38a   :  { %1998 = vmatprep.mubr.msk.f32.mxu1 %vm806_vm0, %v2519_v31  ;;  %v1140_v34 = vcvt.f32.s32 %v3688_v51  ;;  %v1049_v30 = vshll.u32 %v1048_v29, 16  ;;  %v1325_v11 = vshll.u32 %v1324_v53, 16  ;;  %v1062_v26 = vcvt.f32.s32 %v3706_v46 }
 0x38b   :  { %v894_v63 = vadd.s32 %v893_v23, %v891_v2  ;;  %v986_v1 = vadd.s32 %v985_v42, %v983_v38  ;;  %1999 = vmatmul.mubr.msk.f32.gmra.mrb[22].mxu1 %vm714_vm1, %v2519_v31  ;;  %v1233_v42 = vshll.u32 %v1232_v32, 16  ;;  %v1154_v14 = vcvt.f32.s32 %v3708_v9 }
 0x38c   :  { %v1032_v56 = vpop.xlane.xlu0 %1031  ;;  %2460 = vmatpush3.bf16.msra.mxu1 %v2459_v44  ;;  %2488 = vmatpush3.bf16.msra.mxu0 %v2487_v62  ;;  %v1124_v15 = vpop.xlane.xlu1 %1123  ;;  %v1141_v51 = vshll.u32 %v1140_v34, 16  ;;  %v1063_v49 = vshll.u32 %v1062_v26, 16  ;;  %v1246_v46 = vcvt.f32.s32 %v3716_v19  ;;  %v1338_v9 = vcvt.f32.s32 %v3718_v25 }
 0x38d   :  { %v1033_v61 = vcvt.f32.s32 %v1032_v56  ;;  %v1125_v21 = vcvt.f32.s32 %v1124_v15  ;;  %vm990_vm2 = vcmp.eq.s32.totalorder %v4129_v41, %v986_v1  ;;  %vm898_vm3 = vcmp.eq.s32.totalorder %v4129_v41, %v894_v63  ;;  %2462 = vmatprep.subr.bf16.mxu1 %v2461_v39  ;;  %2490 = vmatprep.subr.bf16.mxu0 %v2489_v36 }
 0x38e   :  { %2006 = vmatprep.mubr.msk.f32.mxu0 %vm990_vm2, %v2519_v31  ;;  %v1155_v2 = vshll.u32 %v1154_v14, 16  ;;  %v1247_v12 = vshll.u32 %v1246_v46, 16  ;;  %v1339_v63 = vshll.u32 %v1338_v9, 16  ;;  %v1076_v19 = vcvt.f32.s32 %v3726_v40 }
 0x38f   :  { %v1036_v17 = vadd.s32 %v1035_v48, %v1033_v61  ;;  %v1128_v6 = vadd.s32 %v1127_v52, %v1125_v21  ;;  %2007 = vmatmul.mubr.msk.f32.gmra.mrb[26].mxu0 %vm898_vm3, %v2519_v31  ;;  %v1168_v25 = vcvt.f32.s32 %v3728_v7  ;;  %v1260_v40 = vcvt.f32.s32 %v3734_v45 }
 0x390   :  { %v1216_v13 = vpop.xlane.xlu0 %1215  ;;  %2464 = vmatpush3.bf16.msra.mxu1 %v2463_v37  ;;  %2492 = vmatpush3.bf16.msra.mxu0 %v2491_v59  ;;  %v1308_v47 = vpop.xlane.xlu1 %1307  ;;  %v1352_v7 = vcvt.f32.s32 %v3736_v3 }
 0x391   :  { %vm1079_vm4 = vcmp.eq.s32.totalorder %v4129_v41, %v1036_v17  ;;  %v1217_v57 = vcvt.f32.s32 %v1216_v13  ;;  %v1309_v16 = vcvt.f32.s32 %v1308_v47  ;;  %vm1171_vm5 = vcmp.eq.s32.totalorder %v4129_v41, %v1128_v6  ;;  %2494 = vmatprep.subr.bf16.mxu0 %v2493_v4 }
 0x392   :  { %2008 = vmatprep.mubr.msk.f32.mxu1 %vm1171_vm5, %v2519_v31  ;;  %v1077_v4 = vshll.u32 %v1076_v19, 16  ;;  %v1169_v61 = vshll.u32 %v1168_v25, 16  ;;  %v1353_v29 = vshll.u32 %v1352_v7, 16 }
 0x393   :  { %v1220_v20 = vadd.s32 %v1219_v22, %v1217_v57  ;;  %v1312_v0 = vadd.s32 %v1311_v58, %v1309_v16  ;;  %2009 = vmatmul.mubr.msk.f32.vlgmr.msra.gmra.mrb[24].mxu1 %vm1079_vm4, %v2519_v31  ;;  %v1261_v58 = vshll.u32 %v1260_v40, 16  ;;  %v20_v57 = vld [vmem:[%s4066_s0 + $0x30] sm:$0xff]  ;;  %vm1867_vm4 = vcmask 261120  }
 0x394   :  { %v1046_v23 = vpop.xlane.xlu0 %1045  ;;  %2496 = vmatpush3.bf16.msra.mxu0 %v2495_v43  ;;  %v1138_v33 = vpop.xlane.xlu1 %1137  ;;  %v2520_v16 = vmov 32  }
 0x395   :  { %vm1263_vm6 = vcmp.eq.s32.totalorder %v4129_v41, %v1220_v20  ;;  %v1047_v60 = vcvt.f32.s32 %v1046_v23  ;;  %v1139_v10 = vcvt.f32.s32 %v1138_v33  ;;  %vm1355_vm7 = vcmp.eq.s32.totalorder %v4129_v41, %v1312_v0  ;;  %2515 = vset.pattern.permute.xlu1 %v2520_v16  ;;  %2514 = vset.pattern.permute.xlu0 %v2520_v16 }
 0x396   :  { %2016 = vmatprep.mubr.msk.f32.mxu0 %vm1355_vm7, %v2519_v31  ;;  %1859 = vperm.xlu0 %2514, %v20_v57  }
 0x397   :  { %v1050_v18 = vadd.s32 %v1049_v30, %v1047_v60  ;;  %v1142_v44 = vadd.s32 %v1141_v51, %v1139_v10  ;;  %2017 = vmatmul.mubr.msk.f32.vlgmr.msra.gmra.mrb[28].mxu0 %vm1263_vm6, %v2519_v31 }
 0x398   :  { %v1230_v28 = vpop.xlane.xlu0 %1229  ;;  %v1322_v62 = vpop.xlane.xlu1 %1321 }
 0x399   :  { %v1231_v39 = vcvt.f32.s32 %v1230_v28  ;;  %v1323_v36 = vcvt.f32.s32 %v1322_v62  ;;  %vm1172_vm8 = vcmp.eq.s32.totalorder %v4129_v41, %v1142_v44  ;;  %vm1080_vm9 = vcmp.eq.s32.totalorder %v4129_v41, %v1050_v18 }
 0x39a   :  { %2010 = vmatprep.mubr.msk.f32.mxu1 %vm1172_vm8, %v2519_v31 }
 0x39b   :  { %v1234_v50 = vadd.s32 %v1233_v42, %v1231_v39  ;;  %v1326_v27 = vadd.s32 %v1325_v11, %v1323_v36  ;;  %2011 = vmatmul.mubr.msk.f32.gmra.mrb[26].mxu1 %vm1080_vm9, %v2519_v31 }
 0x39c   :  { %v1060_v38 = vpop.xlane.xlu0 %1059  ;;  %v1152_v54 = vpop.xlane.xlu1 %1151 }
 0x39d   :  { %v1061_v55 = vcvt.f32.s32 %v1060_v38  ;;  %v1153_v5 = vcvt.f32.s32 %v1152_v54  ;;  %vm1356_vm10 = vcmp.eq.s32.totalorder %v4129_v41, %v1326_v27  ;;  %vm1264_vm11 = vcmp.eq.s32.totalorder %v4129_v41, %v1234_v50 }
 0x39e   :  { %2018 = vmatprep.mubr.msk.f32.mxu0 %vm1356_vm10, %v2519_v31 }
 0x39f   :  { %v1064_v48 = vadd.s32 %v1063_v49, %v1061_v55  ;;  %v1156_v52 = vadd.s32 %v1155_v2, %v1153_v5  ;;  %2019 = vmatmul.mubr.msk.f32.gmra.mrb[30].mxu0 %vm1264_vm11, %v2519_v31 }
 0x3a0   :  { %v1244_v1 = vpop.xlane.xlu0 %1243  ;;  %v1336_v24 = vpop.xlane.xlu1 %1335 }
 0x3a1   :  { %v1245_v56 = vcvt.f32.s32 %v1244_v1  ;;  %v1337_v15 = vcvt.f32.s32 %v1336_v24  ;;  %vm1173_vm12 = vcmp.eq.s32.totalorder %v4129_v41, %v1156_v52  ;;  %vm1081_vm13 = vcmp.eq.s32.totalorder %v4129_v41, %v1064_v48 }
 0x3a2   :  { %2012 = vmatprep.mubr.msk.f32.mxu1 %vm1173_vm12, %v2519_v31 }
 0x3a3   :  { %v1248_v37 = vadd.s32 %v1247_v12, %v1245_v56  ;;  %v1340_v59 = vadd.s32 %v1339_v63, %v1337_v15  ;;  %2013 = vmatmul.mubr.msk.f32.gmra.mrb[28].mxu1 %vm1081_vm13, %v2519_v31 }
 0x3a4   :  { %v1074_v21 = vpop.xlane.xlu0 %1073  ;;  %v1166_v35 = vpop.xlane.xlu1 %1165 }
 0x3a5   :  { %v1075_v8 = vcvt.f32.s32 %v1074_v21  ;;  %v1167_v22 = vcvt.f32.s32 %v1166_v35  ;;  %vm1357_vm14 = vcmp.eq.s32.totalorder %v4129_v41, %v1340_v59  ;;  %vm1265_vm15 = vcmp.eq.s32.totalorder %v4129_v41, %v1248_v37  ;;  %v4130_v59 = vld [vmem:[#allocation2_spill] sm:$0xff]  ;;  %v4131_v21 = vld [vmem:[#allocation3_spill] sm:$0xff] }
 0x3a6   :  { %2020 = vmatprep.mubr.msk.f32.mxu0 %vm1357_vm14, %v2519_v31 }
 0x3a7   :  { %v1078_v17 = vadd.s32 %v1077_v4, %v1075_v8  ;;  %v1170_v6 = vadd.s32 %v1169_v61, %v1167_v22  ;;  %2021 = vmatmul.mubr.msk.f32.gmra.mrb[32].mxu0 %vm1265_vm15, %v2519_v31 }
 0x3a8   :  { %v1258_v34 = vpop.xlane.xlu0 %1257  ;;  %v1350_v45 = vpop.xlane.xlu1 %1349 }
 0x3a9   :  { %v1259_v13 = vcvt.f32.s32 %v1258_v34  ;;  %v1351_v3 = vcvt.f32.s32 %v1350_v45  ;;  %vm1174_vm0 = vcmp.eq.s32.totalorder %v4129_v41, %v1170_v6  ;;  %vm1082_vm1 = vcmp.eq.s32.totalorder %v4129_v41, %v1078_v17 }
 0x3aa   :  { %2014 = vmatprep.mubr.msk.f32.mxu1 %vm1174_vm0, %v2519_v31 }
 0x3ab   :  { %v1262_v47 = vadd.s32 %v1261_v58, %v1259_v13  ;;  %v1354_v43 = vadd.s32 %v1353_v29, %v1351_v3  ;;  %2015 = vmatmul.mubr.msk.f32.gmra.mrb[30].mxu1 %vm1082_vm1, %v2519_v31 }
 0x3ac   :  { %2232 = vmatprep.mubr.msk.f32.mxu1 %vm1867_vm4, %v20_v57  ;;  %v4132_v57 = vld [vmem:[#allocation4_spill] sm:$0xff] }
 0x3ad   :  { %vm1358_vm2 = vcmp.eq.s32.totalorder %v4129_v41, %v1354_v43  ;;  %vm1266_vm3 = vcmp.eq.s32.totalorder %v4129_v41, %v1262_v47 }
 0x3ae   :  { %2022 = vmatprep.mubr.msk.f32.mxu0 %vm1358_vm2, %v2519_v31 }
 0x3af   :  { %2023 = vmatmul.mubr.msk.f32.gmra.mrb[34].mxu0 %vm1266_vm3, %v2519_v31 }
 0x446   :  { %v2064_v20 = vpop.f32.mrb[16].mxu1 }
 0x447   :  { %v2065_v0 = vpop.f32.mrb[17].mxu1 }
 0x448   :  { %v2066_v30 = vadd.f32 %v2065_v0, %v2064_v20 }
 0x44a   :  { %v2108_v51 = vpop.f32.mrb[20].mxu0 }
 0x44b   :  { %v2109_v41 = vpop.f32.mrb[21].mxu0 }
 0x44c   :  { %v2110_v32 = vadd.f32 %v2109_v41, %v2108_v51 }
 0x44e   :  { %v1647_v53 = vadd.f32 %v2110_v32, %v2066_v30  ;;  %v2067_v23 = vpop.f32.mrb[18].mxu1 }
 0x44f   :  { %v2068_v31 = vpop.f32.mrb[19].mxu1 }
 0x450   :  { %v2069_v33 = vadd.f32 %v2068_v31, %v2067_v23  ;;  %v4133_v31 = vld [vmem:[#allocation5_spill] sm:$0xff] }
 0x452   :  { %v2111_v60 = vpop.f32.mrb[22].mxu0 }
 0x453   :  { %v2112_v10 = vpop.f32.mrb[23].mxu0 }
 0x454   :  { %v2113_v18 = vadd.f32 %v2112_v10, %v2111_v60 }
 0x456   :  { %v1652_v44 = vadd.f32 %v2113_v18, %v2069_v33  ;;  %v2070_v42 = vpop.f32.mrb[20].mxu1  ;;  %v21_v18 = vld [vmem:[%s4066_s0 + $0x38] sm:$0xf] }
 0x457   :  { %v2071_v11 = vpop.f32.mrb[21].mxu1 }
 0x458   :  { %v2072_v26 = vadd.f32 %v2071_v11, %v2070_v42 }
 0x45a   :  { %v2114_v14 = vpop.f32.mrb[24].mxu0 }
 0x45b   :  { %v2115_v28 = vpop.f32.mrb[25].mxu0 }
 0x45c   :  { %v2116_v62 = vadd.f32 %v2115_v28, %v2114_v14 }
 0x45e   :  { %v1657_v39 = vadd.f32 %v2116_v62, %v2072_v26  ;;  %v2073_v36 = vpop.f32.mrb[22].mxu1 }
 0x45f   :  { %v2074_v50 = vpop.f32.mrb[23].mxu1 }
 0x460   :  { %v2075_v27 = vadd.f32 %v2074_v50, %v2073_v36 }
 0x462   :  { %v2117_v49 = vpop.f32.mrb[26].mxu0 }
 0x463   :  { %v2118_v2 = vpop.f32.mrb[27].mxu0 }
 0x464   :  { %v2119_v46 = vadd.f32 %v2118_v2, %v2117_v49  ;;  %v1860_v49 = vpop.permute.xlu0 %1859 }
 0x466   :  { %v1662_v9 = vadd.f32 %v2119_v46, %v2075_v27  ;;  %v2152_v38 = vpop.f32.mrb[24].mxu1 }
 0x467   :  { %v2153_v54 = vpop.f32.mrb[25].mxu1 }
 0x468   :  { %v2154_v55 = vadd.f32 %v2153_v54, %v2152_v38 }
 0x46a   :  { %v1732_v5 = vadd.f32 %v2154_v55, %v1647_v53  ;;  %v2196_v48 = vpop.f32.mrb[28].mxu0 }
 0x46b   :  { %v2197_v52 = vpop.f32.mrb[29].mxu0 }
 0x46c   :  { %v2198_v12 = vadd.f32 %v2197_v52, %v2196_v48 }
 0x46e   :  { %v1817_v63 = vadd.f32 %v2198_v12, %v1732_v5  ;;  %v2155_v19 = vpop.f32.mrb[26].mxu1 }
 0x46f   :  { %v2156_v25 = vpop.f32.mrb[27].mxu1 }
 0x470   :  { %v2157_v1 = vadd.f32 %v2156_v25, %v2155_v19  ;;  %v1835_v4 = vsub.f32 %v1817_v63, %v4130_v59 }
 0x472   :  { %v1737_v24 = vadd.f32 %v2157_v1, %v1652_v44  ;;  %v2199_v56 = vpop.f32.mrb[30].mxu0  ;;  %v1839_v17 = vmul.f32 %v1835_v4, %v1835_v4 }
 0x473   :  { %v2200_v15 = vpop.f32.mrb[31].mxu0 }
 0x474   :  { %v2201_v37 = vadd.f32 %v2200_v15, %v2199_v56 }
 0x476   :  { %v1822_v61 = vadd.f32 %v2201_v37, %v1737_v24  ;;  %v2158_v40 = vpop.f32.mrb[28].mxu1 }
 0x477   :  { %v2159_v7 = vpop.f32.mrb[29].mxu1 }
 0x478   :  { %v1836_v35 = vsub.f32 %v1822_v61, %v4131_v21  ;;  %v2160_v8 = vadd.f32 %v2159_v7, %v2158_v40  ;;  %v2497_v22 = vpack.c.bf16 %v1822_v61, %v1817_v63 }
 0x47a   :  { %v1840_v6 = vmul.f32 %v1836_v35, %v1836_v35  ;;  %v1742_v58 = vadd.f32 %v2160_v8, %v1657_v39  ;;  %v2202_v29 = vpop.f32.mrb[32].mxu0  ;;  %2498 = vmatprep.subr.bf16.mxu1 %v2497_v22 }
 0x47b   :  { %v2203_v34 = vpop.f32.mrb[33].mxu0  ;;  %2500 = vmatpush3.bf16.msra.mxu1 %v2497_v22 }
 0x47c   :  { %v1843_v45 = vadd.f32 %v1840_v6, %v1839_v17  ;;  %v2204_v13 = vadd.f32 %v2203_v34, %v2202_v29 }
 0x47e   :  { %v1827_v3 = vadd.f32 %v2204_v13, %v1742_v58  ;;  %v2161_v47 = vpop.f32.mrb[30].mxu1 }
 0x47f   :  { %v2162_v43 = vpop.f32.mrb[31].mxu1 }
 0x480   :  { %v1837_v16 = vsub.f32 %v1827_v3, %v4132_v57  ;;  %v2163_v20 = vadd.f32 %v2162_v43, %v2161_v47 }
 0x482   :  { %v1841_v0 = vmul.f32 %v1837_v16, %v1837_v16  ;;  %v1747_v30 = vadd.f32 %v2163_v20, %v1662_v9  ;;  %v2205_v51 = vpop.f32.mrb[34].mxu0 }
 0x483   :  { %v2206_v41 = vpop.f32.mrb[35].mxu0 }
 0x484   :  { %v2207_v32 = vadd.f32 %v2206_v41, %v2205_v51  ;;  %v1844_v53 = vadd.f32 %v1843_v45, %v1841_v0 }
 0x486   :  { %v1832_v23 = vadd.f32 %v2207_v32, %v1747_v30 }
 0x488   :  { %v1838_v33 = vsub.f32 %v1832_v23, %v4133_v31  ;;  %v2501_v60 = vpack.c.bf16 %v1832_v23, %v1827_v3 }
 0x48a   :  { %v1842_v10 = vmul.f32 %v1838_v33, %v1838_v33  ;;  %2502 = vmatprep.subr.bf16.mxu1 %v2501_v60 }
 0x48b   :  { %2504 = vmatpush3.bf16.msra.mxu1 %v2501_v60 }
 0x48c   :  { %v1845_v44 = vadd.f32 %v1844_v53, %v1842_v10 }
 0x48e   :  { %1846 = vadd.xlane.f32.xlu1 %v1845_v44  ;;  %2233 = vmatmul.mubr.msk.f32.vlgmr.msra.gmra.mrb[32].mxu1 %vm1867_vm4, %v21_v18 }
 0x49f   :  { %1864 = vperm.xlu1 %2515, %v21_v18  }
 0x51b   :  { %v1847_v42 = vpop.xlane.xlu1 %1846 }
 0x51c   :  { %v1848_v11 = vrot.slane %v1847_v42, 4 }
 0x51e   :  { %v1849_v26 = vadd.f32 %v1848_v11, %v1847_v42 }
 0x51f   :  { %v1865_v27 = vpop.permute.xlu1 %1864 }
 0x520   :  { %v1850_v14 = vrot.slane %v1849_v26, 2 }
 0x522   :  { %v1851_v28 = vadd.f32 %v1850_v14, %v1849_v26 }
 0x524   :  { %v1852_v62 = vrot.slane %v1851_v28, 1 }
 0x526   :  { %v1853_v39 = vadd.f32 %v1852_v62, %v1851_v28 }
 0x528   :  { %2505 = vpush %v1853_v39 }
 0x559   :  { %s2506_s18 = spop %2505 }
 0x55a   :  { %v1855_v36 = vstv %s2506_s18 }
 0x55b   :  { %v1856_v50 = vmul.f32 0.00048828125, %v1855_v36 }
 0x55d   :  { %1949 = vst [vmem:[%s4069_s3 + $0xc] sm:$0xf] %v1856_v50 }
 0x561   :  { %v2234_v2 = vpop.f32.mrb[32].mxu1 }
 0x562   :  { %v1938_v46 = vpop.f32.mrb[33].mxu1  ;;  %v1944_v9 = vadd.f32 %v2234_v2, %v1865_v27 }
 0x563   :  { %v1939_v38 = vadd.f32 %v1938_v46, %v1860_v49 }
 0x564   :  { %1948 = vst [vmem:[%s4069_s3 + $0x8] sm:$0xf] %v1944_v9 }
 0x565   :  { %1947 = vst [vmem:[%s4069_s3] sm:$0xff] %v1939_v38 }

</bundles_post_ra>
